<compile_context>
chip_gen: v7x
topology: tpu7x:2x2x1
jax: 0.10.0
libtpu: 0.0.40
codegen_flags: <defaults>
</compile_context>

<pallas_src>
import functools

import jax
import jax.numpy as jnp
from jax.experimental import pallas as pl
from jax.experimental.pallas import tpu as pltpu

HP = 128  # lane-padded width for the 2-wide mean / logvar / z head


def _round_up(n, m):
    return (n + m - 1) // m * m


def _leaky(y):
    return jnp.where(y > 0.0, y, 0.2 * y)


# ----------------------------------------------------------------------------
# Kernels
# ----------------------------------------------------------------------------
def _vae_core_kernel(x_ref, w1_ref, b1_ref, w2_ref, b2_ref, wh_ref, bh_ref,
                     eps_ref, wd1_ref, bd1_ref, wd2_ref, bd2_ref,
                     head_ref, d2_ref, acc_ref):
    """Fused enc1(K-tiled) -> enc2 -> mean|logvar -> reparam -> dec1 -> dec2."""
    k = pl.program_id(0)
    nk = pl.num_programs(0)

    @pl.when(k == 0)
    def _():
        acc_ref[...] = jnp.zeros_like(acc_ref)

    # enc1 partial matmul: accumulate x[:, k-tile] @ W1[k-tile, :] in f32.
    acc_ref[...] += jnp.dot(x_ref[...].astype(jnp.bfloat16), w1_ref[...],
                            preferred_element_type=jnp.float32)

    @pl.when(k == nk - 1)
    def _():
        h1 = _leaky(acc_ref[...] + b1_ref[...]).astype(jnp.bfloat16)
        h2 = _leaky(jnp.dot(h1, w2_ref[...],
                            preferred_element_type=jnp.float32)
                    + b2_ref[...]).astype(jnp.bfloat16)
        # merged mean/logvar head: lanes [0:HP] mean-padded, [HP:2HP] logvar-padded
        head = jnp.dot(h2, wh_ref[...],
                       preferred_element_type=jnp.float32) + bh_ref[...]
        head_ref[...] = head.astype(head_ref.dtype)
        mean_p = head[:, :HP]
        logvar_p = head[:, HP:]
        # module semantics: z = mean + logvar * eps (logvar used directly)
        z = (mean_p + logvar_p * eps_ref[...]).astype(jnp.bfloat16)
        d1 = _leaky(jnp.dot(z, wd1_ref[...],
                            preferred_element_type=jnp.float32)
                    + bd1_ref[...]).astype(jnp.bfloat16)
        d2 = _leaky(jnp.dot(d1, wd2_ref[...],
                            preferred_element_type=jnp.float32)
                    + bd2_ref[...])
        d2_ref[...] = d2.astype(d2_ref.dtype)


def _dec3_kernel(d2_ref, w_ref, b_ref, o_ref):
    """x_hat tile = sigmoid(d2 @ Wd3[:, tile] + bd3[tile])  (lane-dense)."""
    y = jnp.dot(d2_ref[...].astype(jnp.bfloat16), w_ref[...],
                preferred_element_type=jnp.float32) + b_ref[...]
    o_ref[...] = jax.nn.sigmoid(y).astype(o_ref.dtype)


# ----------------------------------------------------------------------------
# Parameter construction / preparation
# ----------------------------------------------------------------------------
def _init_linear(key, in_dim, out_dim):
    kw, kb = jax.random.split(key)
    bound = 1.0 / jnp.sqrt(jnp.float32(in_dim))
    # stored (in, out) — already transposed relative to torch's (out, in)
    w = jax.random.uniform(kw, (in_dim, out_dim), jnp.float32, -bound, bound)
    b = jax.random.uniform(kb, (out_dim,), jnp.float32, -bound, bound)
    return w, b


def make_vae_params(key, input_dim, hidden_dim, latent_dim):
    keys = jax.random.split(key, 7)
    return {
        "enc1": _init_linear(keys[0], input_dim, hidden_dim),
        "enc2": _init_linear(keys[1], hidden_dim, latent_dim),
        "mean": _init_linear(keys[2], latent_dim, 2),
        "logvar": _init_linear(keys[3], latent_dim, 2),
        "dec1": _init_linear(keys[4], 2, latent_dim),
        "dec2": _init_linear(keys[5], latent_dim, hidden_dim),
        "dec3": _init_linear(keys[6], hidden_dim, input_dim),
    }


def prepare_params(params, input_dim, hidden_dim, latent_dim):
    """Zero-pad every feature dim to a multiple of 128, merge the mean/logvar
    head into one lane-padded weight, store weights bf16 and biases (1,N) f32."""
    dp = _round_up(input_dim, 128)
    hp = _round_up(hidden_dim, 128)
    lp = _round_up(latent_dim, 128)

    def pad_w(w, rows, cols):
        return jnp.pad(w, ((0, rows - w.shape[0]), (0, cols - w.shape[1])))

    def pad_b(b, cols):
        return jnp.pad(b, (0, cols - b.shape[0])).reshape(1, cols)

    w1, b1 = params["enc1"]
    w2, b2 = params["enc2"]
    wm, bm = params["mean"]
    wv, bv = params["logvar"]
    wd1, bd1 = params["dec1"]
    wd2, bd2 = params["dec2"]
    wd3, bd3 = params["dec3"]

    # merged mean/logvar head: cols [0:2] -> mean, [HP:HP+2] -> logvar
    wh = jnp.zeros((lp, 2 * HP), jnp.float32)
    wh = wh.at[:latent_dim, 0:2].set(wm)
    wh = wh.at[:latent_dim, HP:HP + 2].set(wv)
    bh = jnp.zeros((2 * HP,), jnp.float32)
    bh = bh.at[0:2].set(bm)
    bh = bh.at[HP:HP + 2].set(bv)

    # dec1: Linear(2 -> latent), lane-pad the 2-wide input side to HP
    wd1p = jnp.zeros((HP, lp), jnp.float32)
    wd1p = wd1p.at[0:2, :latent_dim].set(wd1)

    return {
        "input_dim": input_dim, "input_dim_p": dp,
        "hidden_p": hp, "latent_p": lp,
        "w1": pad_w(w1, dp, hp).astype(jnp.bfloat16), "b1": pad_b(b1, hp),
        "w2": pad_w(w2, hp, lp).astype(jnp.bfloat16), "b2": pad_b(b2, lp),
        "wh": wh.astype(jnp.bfloat16), "bh": bh.reshape(1, 2 * HP),
        "wd1": wd1p.astype(jnp.bfloat16), "bd1": pad_b(bd1, lp),
        "wd2": pad_w(wd2, lp, hp).astype(jnp.bfloat16), "bd2": pad_b(bd2, hp),
        "wd3": pad_w(wd3, hp, dp).astype(jnp.bfloat16), "bd3": pad_b(bd3, dp),
    }


# ----------------------------------------------------------------------------
# Forward
# ----------------------------------------------------------------------------
def _pick_k_tile(dim):
    for c in (1024, 512, 256, 128):
        if dim % c == 0:
            return c
    return dim


def _pick_out_tile(dim):
    # lane-dense tile; prefer >=2 grid steps so both v7x TensorCores get work
    for c in (512, 256, 128):
        if dim % c == 0 and dim // c >= 2:
            return c
    return dim


def vae_forward(prepared, x, eps):
    p = prepared
    B = x.shape[0]
    din, dp = p["input_dim"], p["input_dim_p"]
    hp, lp = p["hidden_p"], p["latent_p"]

    # pad activations to lane-aligned widths (no-op when already aligned)
    xp = jnp.pad(x, ((0, 0), (0, dp - din)))
    eps_p = jnp.pad(eps, ((0, 0), (0, HP - eps.shape[1])))

    tk = _pick_k_tile(dp)
    nk = dp // tk
    vmem_limit = 32 * 1024 * 1024  # safe on v5e/v6e/v7x

    # --- fused core: enc1 (K-tiled) -> enc2 -> mean|logvar -> reparam -> dec1 -> dec2
    head, d2 = pl.pallas_call(
        _vae_core_kernel,
        out_shape=(
            jax.ShapeDtypeStruct((B, 2 * HP), jnp.float32),  # mean|logvar head
            jax.ShapeDtypeStruct((B, hp), jnp.float32),      # dec2 activations
        ),
        grid_spec=pltpu.PrefetchScalarGridSpec(
            num_scalar_prefetch=0,
            grid=(nk,),
            in_specs=[
                pl.BlockSpec((B, tk), lambda k: (0, k)),       # x (K-tiled)
                pl.BlockSpec((tk, hp), lambda k: (k, 0)),      # W1 (K-tiled)
                pl.BlockSpec((1, hp), lambda k: (0, 0)),       # b1
                pl.BlockSpec((hp, lp), lambda k: (0, 0)),      # W2
                pl.BlockSpec((1, lp), lambda k: (0, 0)),       # b2
                pl.BlockSpec((lp, 2 * HP), lambda k: (0, 0)),  # W_head
                pl.BlockSpec((1, 2 * HP), lambda k: (0, 0)),   # b_head
                pl.BlockSpec((B, HP), lambda k: (0, 0)),       # eps (padded)
                pl.BlockSpec((HP, lp), lambda k: (0, 0)),      # Wd1
                pl.BlockSpec((1, lp), lambda k: (0, 0)),       # bd1
                pl.BlockSpec((lp, hp), lambda k: (0, 0)),      # Wd2
                pl.BlockSpec((1, hp), lambda k: (0, 0)),       # bd2
            ],
            out_specs=[
                pl.BlockSpec((B, 2 * HP), lambda k: (0, 0)),
                pl.BlockSpec((B, hp), lambda k: (0, 0)),
            ],
            scratch_shapes=[pltpu.VMEM((B, hp), jnp.float32)],
        ),
        compiler_params=pltpu.CompilerParams(
            dimension_semantics=("arbitrary",),
            vmem_limit_bytes=vmem_limit,
        ),
    )(xp, p["w1"], p["b1"], p["w2"], p["b2"], p["wh"], p["bh"],
      eps_p, p["wd1"], p["bd1"], p["wd2"], p["bd2"])

    mean = head[:, 0:2]
    logvar = head[:, HP:HP + 2]

    # --- dec3: wide output matmul + sigmoid, lane-dense tiles, parallel grid
    tn = _pick_out_tile(dp)
    x_hat_p = pl.pallas_call(
        _dec3_kernel,
        out_shape=jax.ShapeDtypeStruct((B, dp), jnp.float32),
        grid_spec=pltpu.PrefetchScalarGridSpec(
            num_scalar_prefetch=0,
            grid=(dp // tn,),
            in_specs=[
                pl.BlockSpec((B, hp), lambda j: (0, 0)),   # d2
                pl.BlockSpec((hp, tn), lambda j: (0, j)),  # Wd3 tile
                pl.BlockSpec((1, tn), lambda j: (0, j)),   # bd3 tile
            ],
            out_specs=pl.BlockSpec((B, tn), lambda j: (0, j)),
        ),
        compiler_params=pltpu.CompilerParams(
            dimension_semantics=("parallel",),
            vmem_limit_bytes=vmem_limit,
        ),
    )(d2, p["wd3"], p["bd3"])

    x_hat = x_hat_p[:, :din]
    return x_hat, mean, logvar


# ----------------------------------------------------------------------------
# Pure-JAX reference (same bf16 weight casts, same math)
# ----------------------------------------------------------------------------
def reference_forward(prepared, x, eps):
    p = prepared
    din, dp = p["input_dim"], p["input_dim_p"]
    xp = jnp.pad(x, ((0, 0), (0, dp - din))).astype(jnp.bfloat16)
    eps_p = jnp.pad(eps, ((0, 0), (0, HP - eps.shape[1])))

    def dot(a, w):
        return jnp.dot(a, w, preferred_element_type=jnp.float32)

    h1 = _leaky(dot(xp, p["w1"]) + p["b1"]).astype(jnp.bfloat16)
    h2 = _leaky(dot(h1, p["w2"]) + p["b2"]).astype(jnp.bfloat16)
    head = dot(h2, p["wh"]) + p["bh"]
    mean = head[:, 0:2]
    logvar = head[:, HP:HP + 2]
    z = (head[:, :HP] + head[:, HP:] * eps_p).astype(jnp.bfloat16)
    d1 = _leaky(dot(z, p["wd1"]) + p["bd1"]).astype(jnp.bfloat16)
    d2 = _leaky(dot(d1, p["wd2"]) + p["bd2"]).astype(jnp.bfloat16)
    x_hat = jax.nn.sigmoid(dot(d2, p["wd3"]) + p["bd3"])[:, :din]
    return x_hat, mean, logvar


# ----------------------------------------------------------------------------
if __name__ == "__main__":
    # Small shapes consistent with the module's structure
    # (original: input_dim=12288, hidden_dim=400, latent_dim=200)
    B, INPUT_DIM, HIDDEN_DIM, LATENT_DIM = 8, 512, 256, 128

    root = jax.random.PRNGKey(0)
    k_params, k_x, k_eps = jax.random.split(root, 3)

    base_params = make_vae_params(k_params, INPUT_DIM, HIDDEN_DIM, LATENT_DIM)
    prepared = prepare_params(base_params, INPUT_DIM, HIDDEN_DIM, LATENT_DIM)

    x = jax.random.uniform(k_x, (B, INPUT_DIM), jnp.float32)
    # epsilon ~ N(0,1): deterministic stand-in for torch.randn_like
    eps = jax.random.normal(k_eps, (B, 2), jnp.float32)

    fwd = jax.jit(functools.partial(vae_forward, prepared))
    x_hat, mean, logvar = fwd(x, eps)
    jax.block_until_ready((x_hat, mean, logvar))

    xh_ref, m_ref, lv_ref = reference_forward(prepared, x, eps)

    assert x_hat.shape == (B, INPUT_DIM)
    assert mean.shape == (B, 2) and logvar.shape == (B, 2)
    assert jnp.allclose(mean, m_ref, atol=5e-3), "mean mismatch"
    assert jnp.allclose(logvar, lv_ref, atol=5e-3), "logvar mismatch"
    assert jnp.allclose(x_hat, xh_ref, atol=5e-3), "x_hat mismatch"

    print("KERNEL_OK")
</pallas_src>

<mosaic_0001>
module attributes {stable_mosaic.version = 11 : i64} {
  func.func @_dec3_kernel(%arg0: i32, %arg1: memref<8x256xf32, #tpu.memory_space<vmem>>, %arg2: memref<256x256xbf16, #tpu.memory_space<vmem>>, %arg3: memref<1x256xf32, #tpu.memory_space<vmem>>, %arg4: memref<8x256xf32, #tpu.memory_space<vmem>>) attributes {dimension_semantics = [#tpu.dimension_semantics<parallel>], iteration_bounds = array<i64: 2>, scalar_prefetch = 0 : i64, scratch_operands = 0 : i64, tpu.core_type = #tpu.core_type<tc>, window_params = [{pipeline_mode = #tpu.pipeline_mode<synchronous>, transform_indices = @transform_0, window_bounds = array<i64: 8, 256>}, {transform_indices = @transform_1, window_bounds = array<i64: 256, 256>}, {transform_indices = @transform_2, window_bounds = array<i64: 1, 256>}, {transform_indices = @transform_3, window_bounds = array<i64: 8, 256>}]} {
    %c0 = arith.constant 0 : index
    %c0_0 = arith.constant 0 : index
    %0 = vector.load %arg1[%c0, %c0_0] : memref<8x256xf32, #tpu.memory_space<vmem>>, vector<8x256xf32>
    %1 = arith.truncf %0 : vector<8x256xf32> to vector<8x256xbf16>
    %c0_1 = arith.constant 0 : index
    %c0_2 = arith.constant 0 : index
    %2 = vector.load %arg2[%c0_1, %c0_2] : memref<256x256xbf16, #tpu.memory_space<vmem>>, vector<256x256xbf16>
    %cst = arith.constant dense<0.000000e+00> : vector<8x256xf32>
    %3 = tpu.matmul %1, %2, %cst {dimension_numbers = #tpu.dot_dimension_numbers<[1], [0], [0], [1], [0, 0, 1, 1], [], []>} : vector<8x256xbf16>, vector<256x256xbf16>, vector<8x256xf32> -> vector<8x256xf32>
    %c0_3 = arith.constant 0 : index
    %c0_4 = arith.constant 0 : index
    %4 = vector.load %arg3[%c0_3, %c0_4] : memref<1x256xf32, #tpu.memory_space<vmem>>, vector<1x256xf32>
    %5 = vector.broadcast %4 : vector<1x256xf32> to vector<8x256xf32>
    %6 = arith.addf %3, %5 : vector<8x256xf32>
    %7 = arith.negf %6 : vector<8x256xf32>
    %8 = math.exp %7 : vector<8x256xf32>
    %cst_5 = arith.constant 1.000000e+00 : f32
    %9 = vector.broadcast %cst_5 : f32 to vector<8x256xf32>
    %10 = arith.addf %9, %8 : vector<8x256xf32>
    %11 = arith.divf %9, %10 : vector<8x256xf32>
    %c0_6 = arith.constant 0 : index
    %c0_7 = arith.constant 0 : index
    %12 = vector.load %arg4[%c0_6, %c0_7] : memref<8x256xf32, #tpu.memory_space<vmem>>, vector<8x256xf32>
    tpu.vector_store %arg4[%c0_6, %c0_7], %11 {strides = array<i32>} : memref<8x256xf32, #tpu.memory_space<vmem>>, vector<8x256xf32>,
    return
  }
  func.func @transform_0(%arg0: i32) -> (i32, i32) {
    %c0_i32 = arith.constant 0 : i32
    %c0_i32_0 = arith.constant 0 : i32
    %c0_i32_1 = arith.constant 0 : i32
    return %c0_i32, %c0_i32_0 : i32, i32
  }
  func.func @transform_1(%arg0: i32) -> (i32, i32) {
    %c0_i32 = arith.constant 0 : i32
    %c0_i32_0 = arith.constant 0 : i32
    return %c0_i32, %arg0 : i32, i32
  }
  func.func @transform_2(%arg0: i32) -> (i32, i32) {
    %c0_i32 = arith.constant 0 : i32
    %c0_i32_0 = arith.constant 0 : i32
    return %c0_i32, %arg0 : i32, i32
  }
  func.func @transform_3(%arg0: i32) -> (i32, i32) {
    %c0_i32 = arith.constant 0 : i32
    %c0_i32_0 = arith.constant 0 : i32
    return %c0_i32, %arg0 : i32, i32
  }
}

module attributes {stable_mosaic.version = 11 : i64} {
  func.func @_vae_core_kernel(%arg0: i32, %arg1: memref<8x512xf32, #tpu.memory_space<vmem>>, %arg2: memref<512x256xbf16, #tpu.memory_space<vmem>>, %arg3: memref<1x256xf32, #tpu.memory_space<vmem>>, %arg4: memref<256x128xbf16, #tpu.memory_space<vmem>>, %arg5: memref<1x128xf32, #tpu.memory_space<vmem>>, %arg6: memref<128x256xbf16, #tpu.memory_space<vmem>>, %arg7: memref<1x256xf32, #tpu.memory_space<vmem>>, %arg8: memref<8x128xf32, #tpu.memory_space<vmem>>, %arg9: memref<128x128xbf16, #tpu.memory_space<vmem>>, %arg10: memref<1x128xf32, #tpu.memory_space<vmem>>, %arg11: memref<128x256xbf16, #tpu.memory_space<vmem>>, %arg12: memref<1x256xf32, #tpu.memory_space<vmem>>, %arg13: memref<8x256xf32, #tpu.memory_space<vmem>>, %arg14: memref<8x256xf32, #tpu.memory_space<vmem>>, %arg15: memref<8x256xf32, #tpu.memory_space<vmem>>) attributes {dimension_semantics = [#tpu.dimension_semantics<arbitrary>], iteration_bounds = array<i64: 1>, scalar_prefetch = 0 : i64, scratch_operands = 1 : i64, tpu.core_type = #tpu.core_type<tc>, window_params = [{transform_indices = @transform_0, window_bounds = array<i64: 8, 512>}, {transform_indices = @transform_1, window_bounds = array<i64: 512, 256>}, {pipeline_mode = #tpu.pipeline_mode<synchronous>, transform_indices = @transform_2, window_bounds = array<i64: 1, 256>}, {pipeline_mode = #tpu.pipeline_mode<synchronous>, transform_indices = @transform_3, window_bounds = array<i64: 256, 128>}, {pipeline_mode = #tpu.pipeline_mode<synchronous>, transform_indices = @transform_4, window_bounds = array<i64: 1, 128>}, {pipeline_mode = #tpu.pipeline_mode<synchronous>, transform_indices = @transform_5, window_bounds = array<i64: 128, 256>}, {pipeline_mode = #tpu.pipeline_mode<synchronous>, transform_indices = @transform_6, window_bounds = array<i64: 1, 256>}, {pipeline_mode = #tpu.pipeline_mode<synchronous>, transform_indices = @transform_7, window_bounds = array<i64: 8, 128>}, {pipeline_mode = #tpu.pipeline_mode<synchronous>, transform_indices = @transform_8, window_bounds = array<i64: 128, 128>}, {pipeline_mode = #tpu.pipeline_mode<synchronous>, transform_indices = @transform_9, window_bounds = array<i64: 1, 128>}, {pipeline_mode = #tpu.pipeline_mode<synchronous>, transform_indices = @transform_10, window_bounds = array<i64: 128, 256>}, {pipeline_mode = #tpu.pipeline_mode<synchronous>, transform_indices = @transform_11, window_bounds = array<i64: 1, 256>}, {pipeline_mode = #tpu.pipeline_mode<synchronous>, transform_indices = @transform_12, window_bounds = array<i64: 8, 256>}, {pipeline_mode = #tpu.pipeline_mode<synchronous>, transform_indices = @transform_13, window_bounds = array<i64: 8, 256>}]} {
    %c0_i32 = arith.constant 0 : i32
    %0 = arith.cmpi eq, %arg0, %c0_i32 : i32
    %1 = arith.extui %0 : i1 to i32
    %c0_i32_0 = arith.constant 0 : i32
    %2 = arith.cmpi ne, %1, %c0_i32_0 : i32
    scf.if %2 {
      %cst_10 = arith.constant 0.000000e+00 : f32
      %13 = vector.broadcast %cst_10 : f32 to vector<8x256xf32>
      %c0_11 = arith.constant 0 : index
      %c0_12 = arith.constant 0 : index
      %14 = vector.load %arg15[%c0_11, %c0_12] : memref<8x256xf32, #tpu.memory_space<vmem>>, vector<8x256xf32>
      tpu.vector_store %arg15[%c0_11, %c0_12], %13 {strides = array<i32>} : memref<8x256xf32, #tpu.memory_space<vmem>>, vector<8x256xf32>,
    } else {
    }
    %c0 = arith.constant 0 : index
    %c0_1 = arith.constant 0 : index
    %3 = vector.load %arg15[%c0, %c0_1] : memref<8x256xf32, #tpu.memory_space<vmem>>, vector<8x256xf32>
    %c0_2 = arith.constant 0 : index
    %c0_3 = arith.constant 0 : index
    %4 = vector.load %arg1[%c0_2, %c0_3] : memref<8x512xf32, #tpu.memory_space<vmem>>, vector<8x512xf32>
    %5 = arith.truncf %4 : vector<8x512xf32> to vector<8x512xbf16>
    %c0_4 = arith.constant 0 : index
    %c0_5 = arith.constant 0 : index
    %6 = vector.load %arg2[%c0_4, %c0_5] : memref<512x256xbf16, #tpu.memory_space<vmem>>, vector<512x256xbf16>
    %cst = arith.constant dense<0.000000e+00> : vector<8x256xf32>
    %7 = tpu.matmul %5, %6, %cst {dimension_numbers = #tpu.dot_dimension_numbers<[1], [0], [0], [1], [0, 0, 1, 1], [], []>} : vector<8x512xbf16>, vector<512x256xbf16>, vector<8x256xf32> -> vector<8x256xf32>
    %8 = arith.addf %3, %7 : vector<8x256xf32>
    %c0_6 = arith.constant 0 : index
    %c0_7 = arith.constant 0 : index
    %9 = vector.load %arg15[%c0_6, %c0_7] : memref<8x256xf32, #tpu.memory_space<vmem>>, vector<8x256xf32>
    tpu.vector_store %arg15[%c0_6, %c0_7], %8 {strides = array<i32>} : memref<8x256xf32, #tpu.memory_space<vmem>>, vector<8x256xf32>,
    %c0_i32_8 = arith.constant 0 : i32
    %10 = arith.cmpi eq, %arg0, %c0_i32_8 : i32
    %11 = arith.extui %10 : i1 to i32
    %c0_i32_9 = arith.constant 0 : i32
    %12 = arith.cmpi ne, %11, %c0_i32_9 : i32
    scf.if %12 {
      %c0_10 = arith.constant 0 : index
      %c0_11 = arith.constant 0 : index
      %13 = vector.load %arg15[%c0_10, %c0_11] : memref<8x256xf32, #tpu.memory_space<vmem>>, vector<8x256xf32>
      %c0_12 = arith.constant 0 : index
      %c0_13 = arith.constant 0 : index
      %14 = vector.load %arg3[%c0_12, %c0_13] : memref<1x256xf32, #tpu.memory_space<vmem>>, vector<1x256xf32>
      %15 = vector.broadcast %14 : vector<1x256xf32> to vector<8x256xf32>
      %16 = arith.addf %13, %15 : vector<8x256xf32>
      %cst_14 = arith.constant 0.000000e+00 : f32
      %17 = vector.broadcast %cst_14 : f32 to vector<8x256xf32>
      %18 = arith.cmpf ogt, %16, %17 : vector<8x256xf32>
      %cst_15 = arith.constant 2.000000e-01 : f32
      %19 = vector.broadcast %cst_15 : f32 to vector<8x256xf32>
      %20 = arith.mulf %19, %16 : vector<8x256xf32>
      %21 = arith.select %18, %16, %20 : vector<8x256xi1>, vector<8x256xf32>
      %22 = arith.truncf %21 : vector<8x256xf32> to vector<8x256xbf16>
      %c0_16 = arith.constant 0 : index
      %c0_17 = arith.constant 0 : index
      %23 = vector.load %arg4[%c0_16, %c0_17] : memref<256x128xbf16, #tpu.memory_space<vmem>>, vector<256x128xbf16>
      %cst_18 = arith.constant dense<0.000000e+00> : vector<8x128xf32>
      %24 = tpu.matmul %22, %23, %cst_18 {dimension_numbers = #tpu.dot_dimension_numbers<[1], [0], [0], [1], [0, 0, 1, 1], [], []>} : vector<8x256xbf16>, vector<256x128xbf16>, vector<8x128xf32> -> vector<8x128xf32>
      %c0_19 = arith.constant 0 : index
      %c0_20 = arith.constant 0 : index
      %25 = vector.load %arg5[%c0_19, %c0_20] : memref<1x128xf32, #tpu.memory_space<vmem>>, vector<1x128xf32>
      %26 = vector.broadcast %25 : vector<1x128xf32> to vector<8x128xf32>
      %27 = arith.addf %24, %26 : vector<8x128xf32>
      %cst_21 = arith.constant 0.000000e+00 : f32
      %28 = vector.broadcast %cst_21 : f32 to vector<8x128xf32>
      %29 = arith.cmpf ogt, %27, %28 : vector<8x128xf32>
      %cst_22 = arith.constant 2.000000e-01 : f32
      %30 = vector.broadcast %cst_22 : f32 to vector<8x128xf32>
      %31 = arith.mulf %30, %27 : vector<8x128xf32>
      %32 = arith.select %29, %27, %31 : vector<8x128xi1>, vector<8x128xf32>
      %33 = arith.truncf %32 : vector<8x128xf32> to vector<8x128xbf16>
      %c0_23 = arith.constant 0 : index
      %c0_24 = arith.constant 0 : index
      %34 = vector.load %arg6[%c0_23, %c0_24] : memref<128x256xbf16, #tpu.memory_space<vmem>>, vector<128x256xbf16>
      %cst_25 = arith.constant dense<0.000000e+00> : vector<8x256xf32>
      %35 = tpu.matmul %33, %34, %cst_25 {dimension_numbers = #tpu.dot_dimension_numbers<[1], [0], [0], [1], [0, 0, 1, 1], [], []>} : vector<8x128xbf16>, vector<128x256xbf16>, vector<8x256xf32> -> vector<8x256xf32>
      %c0_26 = arith.constant 0 : index
      %c0_27 = arith.constant 0 : index
      %36 = vector.load %arg7[%c0_26, %c0_27] : memref<1x256xf32, #tpu.memory_space<vmem>>, vector<1x256xf32>
      %37 = vector.broadcast %36 : vector<1x256xf32> to vector<8x256xf32>
      %38 = arith.addf %35, %37 : vector<8x256xf32>
      %c0_28 = arith.constant 0 : index
      %c0_29 = arith.constant 0 : index
      %39 = vector.load %arg13[%c0_28, %c0_29] : memref<8x256xf32, #tpu.memory_space<vmem>>, vector<8x256xf32>
      tpu.vector_store %arg13[%c0_28, %c0_29], %38 {strides = array<i32>} : memref<8x256xf32, #tpu.memory_space<vmem>>, vector<8x256xf32>,
      %40 = vector.extract_strided_slice %38 {offsets = [0, 0], sizes = [8, 128], strides = [1, 1]} : vector<8x256xf32> to vector<8x128xf32>
      %41 = vector.extract_strided_slice %38 {offsets = [0, 128], sizes = [8, 128], strides = [1, 1]} : vector<8x256xf32> to vector<8x128xf32>
      %c0_30 = arith.constant 0 : index
      %c0_31 = arith.constant 0 : index
      %42 = vector.load %arg8[%c0_30, %c0_31] : memref<8x128xf32, #tpu.memory_space<vmem>>, vector<8x128xf32>
      %43 = arith.mulf %41, %42 : vector<8x128xf32>
      %44 = arith.addf %40, %43 : vector<8x128xf32>
      %45 = arith.truncf %44 : vector<8x128xf32> to vector<8x128xbf16>
      %c0_32 = arith.constant 0 : index
      %c0_33 = arith.constant 0 : index
      %46 = vector.load %arg9[%c0_32, %c0_33] : memref<128x128xbf16, #tpu.memory_space<vmem>>, vector<128x128xbf16>
      %cst_34 = arith.constant dense<0.000000e+00> : vector<8x128xf32>
      %47 = tpu.matmul %45, %46, %cst_34 {dimension_numbers = #tpu.dot_dimension_numbers<[1], [0], [0], [1], [0, 0, 1, 1], [], []>} : vector<8x128xbf16>, vector<128x128xbf16>, vector<8x128xf32> -> vector<8x128xf32>
      %c0_35 = arith.constant 0 : index
      %c0_36 = arith.constant 0 : index
      %48 = vector.load %arg10[%c0_35, %c0_36] : memref<1x128xf32, #tpu.memory_space<vmem>>, vector<1x128xf32>
      %49 = vector.broadcast %48 : vector<1x128xf32> to vector<8x128xf32>
      %50 = arith.addf %47, %49 : vector<8x128xf32>
      %cst_37 = arith.constant 0.000000e+00 : f32
      %51 = vector.broadcast %cst_37 : f32 to vector<8x128xf32>
      %52 = arith.cmpf ogt, %50, %51 : vector<8x128xf32>
      %cst_38 = arith.constant 2.000000e-01 : f32
      %53 = vector.broadcast %cst_38 : f32 to vector<8x128xf32>
      %54 = arith.mulf %53, %50 : vector<8x128xf32>
      %55 = arith.select %52, %50, %54 : vector<8x128xi1>, vector<8x128xf32>
      %56 = arith.truncf %55 : vector<8x128xf32> to vector<8x128xbf16>
      %c0_39 = arith.constant 0 : index
      %c0_40 = arith.constant 0 : index
      %57 = vector.load %arg11[%c0_39, %c0_40] : memref<128x256xbf16, #tpu.memory_space<vmem>>, vector<128x256xbf16>
      %cst_41 = arith.constant dense<0.000000e+00> : vector<8x256xf32>
      %58 = tpu.matmul %56, %57, %cst_41 {dimension_numbers = #tpu.dot_dimension_numbers<[1], [0], [0], [1], [0, 0, 1, 1], [], []>} : vector<8x128xbf16>, vector<128x256xbf16>, vector<8x256xf32> -> vector<8x256xf32>
      %c0_42 = arith.constant 0 : index
      %c0_43 = arith.constant 0 : index
      %59 = vector.load %arg12[%c0_42, %c0_43] : memref<1x256xf32, #tpu.memory_space<vmem>>, vector<1x256xf32>
      %60 = vector.broadcast %59 : vector<1x256xf32> to vector<8x256xf32>
      %61 = arith.addf %58, %60 : vector<8x256xf32>
      %cst_44 = arith.constant 0.000000e+00 : f32
      %62 = vector.broadcast %cst_44 : f32 to vector<8x256xf32>
      %63 = arith.cmpf ogt, %61, %62 : vector<8x256xf32>
      %cst_45 = arith.constant 2.000000e-01 : f32
      %64 = vector.broadcast %cst_45 : f32 to vector<8x256xf32>
      %65 = arith.mulf %64, %61 : vector<8x256xf32>
      %66 = arith.select %63, %61, %65 : vector<8x256xi1>, vector<8x256xf32>
      %c0_46 = arith.constant 0 : index
      %c0_47 = arith.constant 0 : index
      %67 = vector.load %arg14[%c0_46, %c0_47] : memref<8x256xf32, #tpu.memory_space<vmem>>, vector<8x256xf32>
      tpu.vector_store %arg14[%c0_46, %c0_47], %66 {strides = array<i32>} : memref<8x256xf32, #tpu.memory_space<vmem>>, vector<8x256xf32>,
    } else {
    }
    return
  }
  func.func @transform_0(%arg0: i32) -> (i32, i32) {
    %c0_i32 = arith.constant 0 : i32
    %c0_i32_0 = arith.constant 0 : i32
    return %c0_i32, %arg0 : i32, i32
  }
  func.func @transform_1(%arg0: i32) -> (i32, i32) {
    %c0_i32 = arith.constant 0 : i32
    %c0_i32_0 = arith.constant 0 : i32
    return %arg0, %c0_i32 : i32, i32
  }
  func.func @transform_2(%arg0: i32) -> (i32, i32) {
    %c0_i32 = arith.constant 0 : i32
    %c0_i32_0 = arith.constant 0 : i32
    %c0_i32_1 = arith.constant 0 : i32
    return %c0_i32, %c0_i32_0 : i32, i32
  }
  func.func @transform_3(%arg0: i32) -> (i32, i32) {
    %c0_i32 = arith.constant 0 : i32
    %c0_i32_0 = arith.constant 0 : i32
    %c0_i32_1 = arith.constant 0 : i32
    return %c0_i32, %c0_i32_0 : i32, i32
  }
  func.func @transform_4(%arg0: i32) -> (i32, i32) {
    %c0_i32 = arith.constant 0 : i32
    %c0_i32_0 = arith.constant 0 : i32
    %c0_i32_1 = arith.constant 0 : i32
    return %c0_i32, %c0_i32_0 : i32, i32
  }
  func.func @transform_5(%arg0: i32) -> (i32, i32) {
    %c0_i32 = arith.constant 0 : i32
    %c0_i32_0 = arith.constant 0 : i32
    %c0_i32_1 = arith.constant 0 : i32
    return %c0_i32, %c0_i32_0 : i32, i32
  }
  func.func @transform_6(%arg0: i32) -> (i32, i32) {
    %c0_i32 = arith.constant 0 : i32
    %c0_i32_0 = arith.constant 0 : i32
    %c0_i32_1 = arith.constant 0 : i32
    return %c0_i32, %c0_i32_0 : i32, i32
  }
  func.func @transform_7(%arg0: i32) -> (i32, i32) {
    %c0_i32 = arith.constant 0 : i32
    %c0_i32_0 = arith.constant 0 : i32
    %c0_i32_1 = arith.constant 0 : i32
    return %c0_i32, %c0_i32_0 : i32, i32
  }
  func.func @transform_8(%arg0: i32) -> (i32, i32) {
    %c0_i32 = arith.constant 0 : i32
    %c0_i32_0 = arith.constant 0 : i32
    %c0_i32_1 = arith.constant 0 : i32
    return %c0_i32, %c0_i32_0 : i32, i32
  }
  func.func @transform_9(%arg0: i32) -> (i32, i32) {
    %c0_i32 = arith.constant 0 : i32
    %c0_i32_0 = arith.constant 0 : i32
    %c0_i32_1 = arith.constant 0 : i32
    return %c0_i32, %c0_i32_0 : i32, i32
  }
  func.func @transform_10(%arg0: i32) -> (i32, i32) {
    %c0_i32 = arith.constant 0 : i32
    %c0_i32_0 = arith.constant 0 : i32
    %c0_i32_1 = arith.constant 0 : i32
    return %c0_i32, %c0_i32_0 : i32, i32
  }
  func.func @transform_11(%arg0: i32) -> (i32, i32) {
    %c0_i32 = arith.constant 0 : i32
    %c0_i32_0 = arith.constant 0 : i32
    %c0_i32_1 = arith.constant 0 : i32
    return %c0_i32, %c0_i32_0 : i32, i32
  }
  func.func @transform_12(%arg0: i32) -> (i32, i32) {
    %c0_i32 = arith.constant 0 : i32
    %c0_i32_0 = arith.constant 0 : i32
    %c0_i32_1 = arith.constant 0 : i32
    return %c0_i32, %c0_i32_0 : i32, i32
  }
  func.func @transform_13(%arg0: i32) -> (i32, i32) {
    %c0_i32 = arith.constant 0 : i32
    %c0_i32_0 = arith.constant 0 : i32
    %c0_i32_1 = arith.constant 0 : i32
    return %c0_i32, %c0_i32_0 : i32, i32
  }
}

</mosaic_0001>

<bundles_post_ra>
// kernel: vae_forward.3
= control target key start
LH: loop header
LB: loop body
LE: loop exit
PB: predicated region body
PF: predicated region fallthrough
CT: control target
= control target key end

     0   :  { %8 = vsyncpa [#allocation4], 0  ;;  %s1154_s0 = inlined_call_operand.vmem [shape: f32[8,256], index: 0, kind: input, shape index: {}]   ;;  %s1155_s1 = inlined_call_operand.vmem [shape: bf16[256,512], index: 1, kind: input, shape index: {}]   ;;  %s1156_s2 = inlined_call_operand.vmem [shape: f32[1,512], index: 2, kind: input, shape index: {}]   ;;  %s1157_s3 = inlined_call_operand.hbm [shape: f32[8,512], index: 3, kind: output, shape index: {}]  }
   0x1   :  { %10 = vsyncpa [#allocation4 + $0x1], 0  ;;  %s932_s12 = smov 0   ;;  %s934_s13 = smov 0  }
   0x2   :  { %s936_s14 = smov 0   ;;  %s938_s15 = smov 0  }
   0x3 LB: > { %s953_s16 = sadd.s32 4294967295, %s909_s15   ;;  %s701_s17 = sadd.s32 4294967294, %s909_s15   ;;  %s909_s15 = sphi %s938_s15, %s1163_s15   ;;  %s905_s14 = sphi %s936_s14, %s1162_s14   ;;  %s901_s13 = sphi %s934_s13, %s1161_s13   ;;  %s897_s12 = sphi %s932_s12, %s1160_s12  }
   0x4   : > { %s957_s18 = sadd.s32 1, %s909_s15   ;;  %s44_s19 = sadd.s32 1, %s905_s14 }
   0x5   : > { %s41_s20 = ssub.s32 %s909_s15, %s957_s18  ;;  %p51_p0 = scmp.ne.s32.totalorder %s905_s14, %s901_s13 }
   0x6   : > { %p42_p1 = scmp.eq.s32.totalorder %s41_s20, 0  ;;  %p52_p2 = scmp.eq.s32.totalorder %s909_s15, 0 }
   0x7   : > { %p107_p3 = scmp.eq.s32.totalorder %s953_s16, 1  ;;  %p112_p4 = scmp.ne.s32.totalorder %s901_s13, %s897_s12 }
   0x8   : > { %s969_s21 = scalar_select %p42_p1, %s905_s14, %s44_s19  }
   0x9   : > { %p53_p5 = por %p52_p2, %p51_p0  ;;  %p971_p6 = por %p107_p3, %p51_p0 }
   0xa   : > { %p113_p7 = scmp.eq.s32.totalorder %s701_s17, 1  ;;  %p703_p9 = scmp.ge.s32.totalorder %s909_s15, 2 }
   0xc   : > { %p975_p8 = por %p113_p7, %p112_p4  ;;  %132 = sbr.rel (%p703_p9) target bundleno = 39 (0x27), region = 20 }
  0x13   : > { %135 = sbr.rel (!%p53_p5) target bundleno = 39 (0x27), region = 24  ;;  %s137_s24 = sand.u32 (%p53_p5), 1, %s905_s14  }
  0x14   : > { %s750_s25 = sshll.u32 (%p53_p5), %s909_s15, 3  ;;  %s704_s26 = sshll.u32 (%p53_p5), %s137_s24, 8 }
  0x15   : > { %s987_s29 = scalar_lea.vmem (%p53_p5), %s1155_s1, %s750_s25  ;;  %s992_s30 = scalar_lea.vmem (%p53_p5), [#allocation2], %s704_s26 }
  0x16   : > { %v232_v0 = vld [vmem:[%s987_s29] sm:$0xff] (%p53_p5)  ;;  %v234_v1 = vld [vmem:[%s987_s29 + $0x10] sm:$0xff] (%p53_p5) }
  0x17   : > { %v236_v2 = vld [vmem:[%s987_s29 + $0x20] sm:$0xff] (%p53_p5)  ;;  %233 = vst [vmem:[%s992_s30] sm:$0xff] (%p53_p5), %v232_v0  ;;  %235 = vst [vmem:[%s992_s30 + $0x8] sm:$0xff] (%p53_p5), %v234_v1  ;;  %v238_v3 = vld [vmem:[%s987_s29 + $0x30] sm:$0xff] (%p53_p5) }
  0x18   : > { %237 = vst [vmem:[%s992_s30 + $0x10] sm:$0xff] (%p53_p5), %v236_v2  ;;  %v240_v4 = vld [vmem:[%s987_s29 + $0x40] sm:$0xff] (%p53_p5)  ;;  %v242_v5 = vld [vmem:[%s987_s29 + $0x50] sm:$0xff] (%p53_p5)  ;;  %239 = vst [vmem:[%s992_s30 + $0x18] sm:$0xff] (%p53_p5), %v238_v3 }
  0x19   : > { %241 = vst [vmem:[%s992_s30 + $0x20] sm:$0xff] (%p53_p5), %v240_v4  ;;  %243 = vst [vmem:[%s992_s30 + $0x28] sm:$0xff] (%p53_p5), %v242_v5  ;;  %v244_v6 = vld [vmem:[%s987_s29 + $0x60] sm:$0xff] (%p53_p5)  ;;  %v246_v7 = vld [vmem:[%s987_s29 + $0x70] sm:$0xff] (%p53_p5) }
  0x1a   : > { %v248_v8 = vld [vmem:[%s987_s29 + $0x80] sm:$0xff]  ;;  %245 = vst [vmem:[%s992_s30 + $0x30] sm:$0xff] %v244_v6  ;;  %247 = vst [vmem:[%s992_s30 + $0x38] sm:$0xff] %v246_v7  ;;  %v250_v9 = vld [vmem:[%s987_s29 + $0x90] sm:$0xff] }
  0x1b   : > { %249 = vst [vmem:[%s992_s30 + $0x40] sm:$0xff] %v248_v8  ;;  %v252_v10 = vld [vmem:[%s987_s29 + $0xa0] sm:$0xff]  ;;  %v254_v11 = vld [vmem:[%s987_s29 + $0xb0] sm:$0xff]  ;;  %251 = vst [vmem:[%s992_s30 + $0x48] sm:$0xff] %v250_v9 }
  0x1c   : > { %253 = vst [vmem:[%s992_s30 + $0x50] sm:$0xff] %v252_v10  ;;  %255 = vst [vmem:[%s992_s30 + $0x58] sm:$0xff] %v254_v11  ;;  %v256_v12 = vld [vmem:[%s987_s29 + $0xc0] sm:$0xff]  ;;  %v258_v13 = vld [vmem:[%s987_s29 + $0xd0] sm:$0xff] }
  0x1d   : > { %v260_v14 = vld [vmem:[%s987_s29 + $0xe0] sm:$0xff]  ;;  %257 = vst [vmem:[%s992_s30 + $0x60] sm:$0xff] %v256_v12  ;;  %259 = vst [vmem:[%s992_s30 + $0x68] sm:$0xff] %v258_v13  ;;  %v262_v15 = vld [vmem:[%s987_s29 + $0xf0] sm:$0xff] }
  0x1e   : > { %261 = vst [vmem:[%s992_s30 + $0x70] sm:$0xff] %v260_v14  ;;  %v264_v16 = vld [vmem:[%s987_s29 + $0x100] sm:$0xff]  ;;  %v266_v17 = vld [vmem:[%s987_s29 + $0x110] sm:$0xff]  ;;  %263 = vst [vmem:[%s992_s30 + $0x78] sm:$0xff] %v262_v15 }
  0x1f   : > { %265 = vst [vmem:[%s992_s30 + $0x80] sm:$0xff] %v264_v16  ;;  %267 = vst [vmem:[%s992_s30 + $0x88] sm:$0xff] %v266_v17  ;;  %v268_v18 = vld [vmem:[%s987_s29 + $0x120] sm:$0xff]  ;;  %v270_v19 = vld [vmem:[%s987_s29 + $0x130] sm:$0xff] }
  0x20   : > { %v272_v20 = vld [vmem:[%s987_s29 + $0x140] sm:$0xff]  ;;  %269 = vst [vmem:[%s992_s30 + $0x90] sm:$0xff] %v268_v18  ;;  %271 = vst [vmem:[%s992_s30 + $0x98] sm:$0xff] %v270_v19  ;;  %v274_v21 = vld [vmem:[%s987_s29 + $0x150] sm:$0xff] }
  0x21   : > { %273 = vst [vmem:[%s992_s30 + $0xa0] sm:$0xff] %v272_v20  ;;  %v276_v22 = vld [vmem:[%s987_s29 + $0x160] sm:$0xff]  ;;  %v278_v23 = vld [vmem:[%s987_s29 + $0x170] sm:$0xff]  ;;  %275 = vst [vmem:[%s992_s30 + $0xa8] sm:$0xff] %v274_v21 }
  0x22   : > { %277 = vst [vmem:[%s992_s30 + $0xb0] sm:$0xff] %v276_v22  ;;  %279 = vst [vmem:[%s992_s30 + $0xb8] sm:$0xff] %v278_v23  ;;  %v280_v24 = vld [vmem:[%s987_s29 + $0x180] sm:$0xff]  ;;  %v282_v25 = vld [vmem:[%s987_s29 + $0x190] sm:$0xff] }
  0x23   : > { %v284_v26 = vld [vmem:[%s987_s29 + $0x1a0] sm:$0xff]  ;;  %281 = vst [vmem:[%s992_s30 + $0xc0] sm:$0xff] %v280_v24  ;;  %283 = vst [vmem:[%s992_s30 + $0xc8] sm:$0xff] %v282_v25  ;;  %v286_v27 = vld [vmem:[%s987_s29 + $0x1b0] sm:$0xff] }
  0x24   : > { %285 = vst [vmem:[%s992_s30 + $0xd0] sm:$0xff] %v284_v26  ;;  %v288_v28 = vld [vmem:[%s987_s29 + $0x1c0] sm:$0xff]  ;;  %v290_v29 = vld [vmem:[%s987_s29 + $0x1d0] sm:$0xff]  ;;  %287 = vst [vmem:[%s992_s30 + $0xd8] sm:$0xff] %v286_v27 }
  0x25   : > { %289 = vst [vmem:[%s992_s30 + $0xe0] sm:$0xff] %v288_v28  ;;  %291 = vst [vmem:[%s992_s30 + $0xe8] sm:$0xff] %v290_v29  ;;  %v292_v30 = vld [vmem:[%s987_s29 + $0x1e0] sm:$0xff]  ;;  %v294_v31 = vld [vmem:[%s987_s29 + $0x1f0] sm:$0xff] }
  0x26   : > { %293 = vst [vmem:[%s992_s30 + $0xf0] sm:$0xff] %v292_v30  ;;  %295 = vst [vmem:[%s992_s30 + $0xf8] sm:$0xff] %v294_v31 }
  0x27 PF: > { %p707_p10 = scmp.ge.s32.totalorder %s909_s15, 1  ;;  %p308_p11 = scmp.lt.s32.totalorder %s909_s15, 3 }
  0x29   : > { %p309_p12 = pnand %p707_p10, %p308_p11 }
  0x2a   : > { %s1058_s4 = sand.u32 (!%p309_p12), 1, %s901_s13   ;;  %v350_v32 = vld [vmem:[%s1154_s0 + $0x8] sm:$0xff] (!%p309_p12)  ;;  %v349_v2 = vld [vmem:[%s1154_s0] sm:$0xff] (!%p309_p12)  ;;  %s710_s11 = sshll.u32 (!%p309_p12), %s953_s16, 1  ;;  %v387_v4 = vlaneseq (!%p309_p12) }
  0x2b   : > { %312 = sbr.rel (%p309_p12) target bundleno = 365 (0x16d), region = 66  ;;  %s708_s7 = sshll.u32 (!%p309_p12), %s1058_s4, 8  ;;  %v352_v33 = vpack.c.bf16 (!%p309_p12), %v350_v32, %v350_v32  ;;  %v351_v3 = vpack.c.bf16 (!%p309_p12), %v349_v2, %v349_v2 }
  0x2c   : > { %s1064_s8 = scalar_lea.vmem (!%p309_p12), [#allocation2], %s708_s7  ;;  %p344_p13 = scmp.lt.s32.totalorder (!%p309_p12), %s710_s11, 3  ;;  %v388_v5 = vshrl.u32 (!%p309_p12), %v387_v4, 7 }
  0x2d   : > { %v791_v34 = vld [vmem:[%s1064_s8 + $0x4] ss:$8 sps:$4 sm:$0xff] (!%p309_p12)   ;;  %589 = vmatprep.mubr.bf16.mxu0 (!%p309_p12), %v352_v33  ;;  %v793_v35 = vld [vmem:[%s1064_s8] ss:$8 sps:$4 sm:$0xff] (!%p309_p12)   ;;  %v794_v36 = vld [vmem:[%s1064_s8 + $0x14] ss:$8 sps:$4 sm:$0xff] (!%p309_p12)  }
  0x2e   : > { %557 = vmatprep.subr.bf16.mxu0 (!%p309_p12), %v791_v34  ;;  %v796_v37 = vld [vmem:[%s1064_s8 + $0x10] ss:$8 sps:$4 sm:$0xff] (!%p309_p12)   ;;  %v797_v38 = vld [vmem:[%s1064_s8 + $0x24] ss:$8 sps:$4 sm:$0xff] (!%p309_p12)   ;;  %v799_v39 = vld [vmem:[%s1064_s8 + $0x20] ss:$8 sps:$4 sm:$0xff] (!%p309_p12)  }
  0x2f   : > { %558 = vmatpush1.bf16.msra.mxu0 (!%p309_p12), %v793_v35  ;;  %v800_v40 = vld [vmem:[%s1064_s8 + $0x34] ss:$8 sps:$4 sm:$0xff] (!%p309_p12)   ;;  %v802_v41 = vld [vmem:[%s1064_s8 + $0x30] ss:$8 sps:$4 sm:$0xff] (!%p309_p12)   ;;  %v803_v42 = vld [vmem:[%s1064_s8 + $0x44] ss:$8 sps:$4 sm:$0xff] (!%p309_p12)  }
  0x30   : > { %559 = vmatprep.subr.bf16.mxu0 (!%p309_p12), %v794_v36  ;;  %v805_v43 = vld [vmem:[%s1064_s8 + $0x40] ss:$8 sps:$4 sm:$0xff] (!%p309_p12)   ;;  %v806_v44 = vld [vmem:[%s1064_s8 + $0x54] ss:$8 sps:$4 sm:$0xff] (!%p309_p12)   ;;  %v808_v45 = vld [vmem:[%s1064_s8 + $0x50] ss:$8 sps:$4 sm:$0xff] (!%p309_p12)  }
  0x31   : > { %v809_v46 = vld [vmem:[%s1064_s8 + $0x64] ss:$8 sps:$4 sm:$0xff] (!%p309_p12)   ;;  %v811_v47 = vld [vmem:[%s1064_s8 + $0x60] ss:$8 sps:$4 sm:$0xff] (!%p309_p12)   ;;  %v812_v48 = vld [vmem:[%s1064_s8 + $0x74] ss:$8 sps:$4 sm:$0xff] (!%p309_p12)  }
  0x32   : > { %v814_v49 = vld [vmem:[%s1064_s8 + $0x70] ss:$8 sps:$4 sm:$0xff]   ;;  %v815_v50 = vld [vmem:[%s1064_s8 + $0x84] ss:$8 sps:$4 sm:$0xff]   ;;  %v817_v51 = vld [vmem:[%s1064_s8 + $0x80] ss:$8 sps:$4 sm:$0xff]  }
  0x33   : > { %560 = vmatpush1.bf16.msra.mxu0 %v796_v37  ;;  %v818_v52 = vld [vmem:[%s1064_s8 + $0x94] ss:$8 sps:$4 sm:$0xff]   ;;  %v820_v53 = vld [vmem:[%s1064_s8 + $0x90] ss:$8 sps:$4 sm:$0xff]   ;;  %v821_v54 = vld [vmem:[%s1064_s8 + $0xa4] ss:$8 sps:$4 sm:$0xff]  }
  0x34   : > { %561 = vmatprep.subr.bf16.mxu0 %v797_v38  ;;  %v823_v55 = vld [vmem:[%s1064_s8 + $0xa0] ss:$8 sps:$4 sm:$0xff]   ;;  %v824_v56 = vld [vmem:[%s1064_s8 + $0xb4] ss:$8 sps:$4 sm:$0xff]   ;;  %v826_v57 = vld [vmem:[%s1064_s8 + $0xb0] ss:$8 sps:$4 sm:$0xff]  }
  0x35   : > { %v827_v58 = vld [vmem:[%s1064_s8 + $0xc4] ss:$8 sps:$4 sm:$0xff]   ;;  %v829_v59 = vld [vmem:[%s1064_s8 + $0xc0] ss:$8 sps:$4 sm:$0xff]   ;;  %v830_v60 = vld [vmem:[%s1064_s8 + $0xd4] ss:$8 sps:$4 sm:$0xff]  }
  0x36   : > { %v832_v61 = vld [vmem:[%s1064_s8 + $0xd0] ss:$8 sps:$4 sm:$0xff]   ;;  %v833_v62 = vld [vmem:[%s1064_s8 + $0xe4] ss:$8 sps:$4 sm:$0xff]   ;;  %v835_v63 = vld [vmem:[%s1064_s8 + $0xe0] ss:$8 sps:$4 sm:$0xff]  }
  0x37   : > { %562 = vmatpush1.bf16.msra.mxu0 %v799_v39  ;;  %v836_v0 = vld [vmem:[%s1064_s8 + $0xf4] ss:$8 sps:$4 sm:$0xff]   ;;  %v838_v1 = vld [vmem:[%s1064_s8 + $0xf0] ss:$8 sps:$4 sm:$0xff]   ;;  %s1165_s11 = smov (!%p344_p13, %s710_s11), 3  ;;  %v389_v6 = vsub.s32 0, %v388_v5 }
  0x38   : > { %563 = vmatprep.subr.bf16.mxu0 %v800_v40  ;;  %s346_s20 = scalar_lea.vmem %s1156_s2, %s1165_s11  ;;  %v393_v8 = vsub.s32 1, %v388_v5  ;;  %s709_s24 = sshll.u32 %s1058_s4, 4 }
  0x39   : > { %v385_v7 = vld [vmem:[%s346_s20] sm:$0x3]  ;;  %s751_s25 = sshll.u32 %s953_s16, 8  ;;  %s341_s26 = scalar_lea.vmem [#allocation3], %s709_s24 }
  0x3a   : > { %v390_v9 = vrot.slane %v385_v7, %v389_v6  ;;  %v394_v10 = vrot.slane %v385_v7, %v393_v8  ;;  %s627_s27 = sshll.u32 %s341_s26, 4  ;;  %s1110_s30 = scalar_lea.hbm %s1157_s3, %s751_s25  ;;  %s1112_s27 = int_to_ptr.vmem [resolvable:$true] %s627_s27 }
  0x3b   : > { %564 = vmatpush1.bf16.msra.mxu0 %v802_v41  ;;  %s613_s5 = scalar_lea.sflag [#allocation4], %s1058_s4  ;;  %s847_s6 = scalar_lea.vmem %s1112_s27, 256 }
  0x3c   : > { %565 = vmatprep.subr.bf16.mxu0 %v803_v42  ;;  %p848_p0 = scmp.ne.s32.totalorder %s1112_s27, %s847_s6  ;;  %s911_s16 = smov [#allocation3]  }
  0x3d   : > { %s851_s7 = sshll.u32 %s911_s16, 4  ;;  %s852_s7 = int_to_ptr.vmem [resolvable:$false] %s851_s7 }
  0x3e   : > { %p849_p1 = pnand %p848_p0, %p971_p6  ;;  %s853_s8 = scalar_lea.vmem %s852_s7, 512 }
  0x3f   : > { %566 = vmatpush1.bf16.msra.mxu0 %v805_v43  ;;  %p854_p3 = scmp.lt.s32.totalorder %s1112_s27, %s852_s7  ;;  %p855_p4 = scmp.lt.s32.totalorder %s853_s8, %s847_s6 }
  0x40   : > { %567 = vmatprep.subr.bf16.mxu0 %v806_v44  ;;  %p850_p2 = pneg %p849_p1 }
  0x41   : > { %p856_p5 = por %p855_p4, %p854_p3 }
  0x43   : > { %568 = vmatpush1.bf16.msra.mxu0 %v808_v45  ;;  %p857_p7 = pnand %p856_p5, %p850_p2 }
  0x44   : > { %569 = vmatprep.subr.bf16.mxu0 %v809_v46 }
  0x47   : > { %570 = vmatpush1.bf16.msra.mxu0 %v811_v47 }
  0x48   : > { %571 = vmatprep.subr.bf16.mxu0 %v812_v48 }
  0x4b   : > { %572 = vmatpush1.bf16.msra.mxu0 %v814_v49 }
  0x4c   : > { %573 = vmatprep.subr.bf16.mxu0 %v815_v50 }
  0x4f   : > { %574 = vmatpush1.bf16.msra.mxu0 %v817_v51 }
  0x50   : > { %575 = vmatprep.subr.bf16.mxu0 %v818_v52 }
  0x53   : > { %576 = vmatpush1.bf16.msra.mxu0 %v820_v53 }
  0x54   : > { %577 = vmatprep.subr.bf16.mxu0 %v821_v54 }
  0x57   : > { %578 = vmatpush1.bf16.msra.mxu0 %v823_v55 }
  0x58   : > { %579 = vmatprep.subr.bf16.mxu0 %v824_v56 }
  0x5b   : > { %580 = vmatpush1.bf16.msra.mxu0 %v826_v57 }
  0x5c   : > { %581 = vmatprep.subr.bf16.mxu0 %v827_v58 }
  0x5f   : > { %582 = vmatpush1.bf16.msra.mxu0 %v829_v59 }
  0x60   : > { %583 = vmatprep.subr.bf16.mxu0 %v830_v60 }
  0x63   : > { %584 = vmatpush1.bf16.msra.mxu0 %v832_v61 }
  0x64   : > { %585 = vmatprep.subr.bf16.mxu0 %v833_v62 }
  0x67   : > { %586 = vmatpush1.bf16.msra.mxu0 %v835_v63 }
  0x68   : > { %587 = vmatprep.subr.bf16.mxu0 %v836_v0 }
  0x6b   : > { %588 = vmatpush1.bf16.msra.mxu0 %v838_v1 }
  0x6e   : > { %590 = vmatmul.mubr.bf16.vlgmr.msra.gmra.mrb[0].mxu0 %v351_v3 }
 0x141   : > { %v591_v11 = vpop.f32.mrb[0].mxu0 }
 0x142   : > { %v592_v12 = vadd.f32 %v591_v11, %v390_v9  ;;  %v593_v13 = vpop.f32.mrb[1].mxu0 }
 0x143   : > { %v594_v14 = vadd.f32 %v593_v13, %v394_v10  ;;  %v595_v15 = vpop.f32.mrb[2].mxu0 }
 0x144   : > { %v743_v16 = vmul.f32 -1.442695, %v592_v12  ;;  %v596_v17 = vpop.f32.mrb[3].mxu0 }
 0x145   : > { %v744_v18 = vmul.f32 -1.442695, %v594_v14 }
 0x146   : > { %839 = vpow2.f32 %v743_v16 }
 0x147   : > { %841 = vpow2.f32 %v744_v18 }
 0x150   : > { %v840_v19 = vpop.eup %839 }
 0x151   : > { %v842_v20 = vpop.eup %841  ;;  %v604_v21 = vadd.f32 1.0, %v840_v19 }
 0x152   : > { %v605_v22 = vadd.f32 1.0, %v842_v20 }
 0x153   : > { %843 = vrcp.f32 %v604_v21 }
 0x154   : > { %845 = vrcp.f32 %v605_v22 }
 0x15d   : > { %v844_v23 = vpop.eup %843 }
 0x15e   : > { %v846_v24 = vpop.eup %845  ;;  %610 = vst [vmem:[%s341_s26] sm:$0xff] %v844_v23 }
 0x15f   : > { %611 = vst [vmem:[%s341_s26 + $0x8] sm:$0xff] %v846_v24 }
 0x160   : > { %860 = shalt.err (!%p857_p7)
}
 0x161   : > { %s861_s4 = scalar_lea.hbm %s1110_s30, 256  ;;  %s865_s11 = scalar_lea.hbm %s1157_s3, 512 }
 0x162   : > { %p862_p10 = scmp.ne.s32.totalorder %s1110_s30, %s861_s4  ;;  %p866_p13 = scmp.lt.u32.totalorder %s1110_s30, %s1157_s3 }
 0x163   : > { %p867_p0 = scmp.lt.u32.totalorder %s865_s11, %s861_s4  ;;  %p869_p2 = scmp.lt.u32.totalorder %s861_s4, %s1110_s30 }
 0x164   : > { %p863_p11 = pnand %p862_p10, %p971_p6 }
 0x165   : > { %p868_p1 = por %p867_p0, %p866_p13 }
 0x166   : > { %p864_p12 = pneg %p863_p11 }
 0x167   : > { %p870_p3 = por %p869_p2, %p868_p1 }
 0x169   : > { %p871_p4 = pnand %p870_p3, %p864_p12 }
 0x16b   : > { %874 = shalt.err (!%p871_p4)
}
 0x16c   : > { %752 = dma.vmem_to_hbm [thread:$0]  (%p971_p6), %s1112_s27, 256, %s1110_s30, %s613_s5  }
 0x16d PF: > { %s639_s20 = sand.u32 1, %s897_s12   ;;  %p755_p5 = pnand %p703_p9, %p975_p8 }
 0x16e   : > { %s640_s24 = scalar_lea.sflag [#allocation4], %s639_s20 }
 0x16f   : > { %892 = dma.done.wait (!%p755_p5), %s640_s24, 256  }
 0x170   : > { %894 = vsyncadd (!%p755_p5), %s640_s24, 4294967040  ;;  %p13_p7 = scmp.ge.s32.totalorder %s957_s18, 4   ;;  %s1160_s12 = smov %s901_s13 }
 0x171   : > { %s1161_s13 = smov %s905_s14  ;;  %s1162_s14 = smov %s969_s21 }
 0x172   : > { %s1163_s15 = smov %s957_s18  ;;  %15 = sbr.rel (!%p13_p7) target bundleno = 3 (0x3), region = 113 }
 0x179   :  { %645 = vsyncpa [#allocation4], 1 }
 0x17a   :  { %647 = vsyncpa [#allocation4 + $0x1], 1 }

// kernel: vae_forward.2
= control target key start
LH: loop header
LB: loop body
LE: loop exit
PB: predicated region body
PF: predicated region fallthrough
CT: control target
= control target key end

     0   :  { %vm1517_vm3 = vmmov 0   ;;  %s2000_s1 = inlined_call_operand.vmem [shape: bf16[512,256], index: 1, kind: input, shape index: {}]   ;;  %s2001_s0 = inlined_call_operand.vmem [shape: f32[8,512], index: 0, kind: input, shape index: {}]   ;;  %s2002_s3 = inlined_call_operand.vmem [shape: bf16[256,128], index: 3, kind: input, shape index: {}]   ;;  %s2003_s5 = inlined_call_operand.vmem [shape: bf16[128,256], index: 5, kind: input, shape index: {}]   ;;  %s2004_s2 = inlined_call_operand.vmem [shape: f32[1,256], index: 2, kind: input, shape index: {}]   ;;  %s2005_s8 = inlined_call_operand.vmem [shape: bf16[128,128], index: 8, kind: input, shape index: {}]   ;;  %s2006_s4 = inlined_call_operand.vmem [shape: f32[1,128], index: 4, kind: input, shape index: {}]   ;;  %s2007_s10 = inlined_call_operand.vmem [shape: bf16[128,256], index: 10, kind: input, shape index: {}]   ;;  %s2008_s6 = inlined_call_operand.vmem [shape: f32[1,256], index: 6, kind: input, shape index: {}]   ;;  %s2009_s7 = inlined_call_operand.vmem [shape: f32[8,128], index: 7, kind: input, shape index: {}]   ;;  %s2010_s12 = inlined_call_operand.vmem [shape: f32[8,256], index: 12, kind: output, shape index: {0}]   ;;  %s2011_s9 = inlined_call_operand.vmem [shape: f32[1,128], index: 9, kind: input, shape index: {}]   ;;  %s2012_s11 = inlined_call_operand.vmem [shape: f32[1,256], index: 11, kind: input, shape index: {}]   ;;  %s2013_s13 = inlined_call_operand.vmem [shape: f32[8,256], index: 13, kind: output, shape index: {1}]  }
   0x1   :  { %v1347_v0 = vld [vmem:[%s2000_s1 + $0x4] ss:$8 sps:$4 sm:$0xff]   ;;  %v1351_v2 = vld [vmem:[%s2000_s1] ss:$8 sps:$4 sm:$0xff]   ;;  %v1353_v4 = vld [vmem:[%s2000_s1 + $0x14] ss:$8 sps:$4 sm:$0xff]  }
   0x2   :  { %v1349_v1 = vld [vmem:[%s2000_s1 + $0x104] ss:$8 sps:$4 sm:$0xff]   ;;  %444 = vmatprep.subr.bf16.mxu0 %v1347_v0  ;;  %v1352_v3 = vld [vmem:[%s2000_s1 + $0x100] ss:$8 sps:$4 sm:$0xff]   ;;  %v1355_v5 = vld [vmem:[%s2000_s1 + $0x114] ss:$8 sps:$4 sm:$0xff]  }
   0x3   :  { %485 = vmatprep.subr.bf16.mxu1 %v1349_v1  ;;  %445 = vmatpush1.bf16.msra.mxu0 %v1351_v2  ;;  %v1357_v6 = vld [vmem:[%s2000_s1 + $0x10] ss:$8 sps:$4 sm:$0xff]   ;;  %v1359_v8 = vld [vmem:[%s2000_s1 + $0x24] ss:$8 sps:$4 sm:$0xff]   ;;  %v1363_v10 = vld [vmem:[%s2000_s1 + $0x20] ss:$8 sps:$4 sm:$0xff]  }
   0x4   :  { %486 = vmatpush1.bf16.msra.mxu1 %v1352_v3  ;;  %446 = vmatprep.subr.bf16.mxu0 %v1353_v4  ;;  %v1358_v7 = vld [vmem:[%s2000_s1 + $0x110] ss:$8 sps:$4 sm:$0xff]   ;;  %v1361_v9 = vld [vmem:[%s2000_s1 + $0x124] ss:$8 sps:$4 sm:$0xff]   ;;  %v1364_v11 = vld [vmem:[%s2000_s1 + $0x120] ss:$8 sps:$4 sm:$0xff]  }
   0x5   :  { %487 = vmatprep.subr.bf16.mxu1 %v1355_v5  ;;  %v1365_v12 = vld [vmem:[%s2000_s1 + $0x34] ss:$8 sps:$4 sm:$0xff]   ;;  %v1369_v14 = vld [vmem:[%s2000_s1 + $0x30] ss:$8 sps:$4 sm:$0xff]   ;;  %v1371_v16 = vld [vmem:[%s2000_s1 + $0x44] ss:$8 sps:$4 sm:$0xff]  }
   0x6   :  { %v1367_v13 = vld [vmem:[%s2000_s1 + $0x134] ss:$8 sps:$4 sm:$0xff]   ;;  %v1370_v15 = vld [vmem:[%s2000_s1 + $0x130] ss:$8 sps:$4 sm:$0xff]   ;;  %v1373_v17 = vld [vmem:[%s2000_s1 + $0x144] ss:$8 sps:$4 sm:$0xff]  }
   0x7   :  { %447 = vmatpush1.bf16.msra.mxu0 %v1357_v6  ;;  %v1375_v18 = vld [vmem:[%s2000_s1 + $0x40] ss:$8 sps:$4 sm:$0xff]   ;;  %v1377_v20 = vld [vmem:[%s2000_s1 + $0x54] ss:$8 sps:$4 sm:$0xff]   ;;  %v1381_v22 = vld [vmem:[%s2000_s1 + $0x50] ss:$8 sps:$4 sm:$0xff]  }
   0x8   :  { %488 = vmatpush1.bf16.msra.mxu1 %v1358_v7  ;;  %448 = vmatprep.subr.bf16.mxu0 %v1359_v8  ;;  %v1376_v19 = vld [vmem:[%s2000_s1 + $0x140] ss:$8 sps:$4 sm:$0xff]   ;;  %v1379_v21 = vld [vmem:[%s2000_s1 + $0x154] ss:$8 sps:$4 sm:$0xff]   ;;  %v1382_v23 = vld [vmem:[%s2000_s1 + $0x150] ss:$8 sps:$4 sm:$0xff]  }
   0x9   :  { %489 = vmatprep.subr.bf16.mxu1 %v1361_v9  ;;  %v1383_v24 = vld [vmem:[%s2000_s1 + $0x64] ss:$8 sps:$4 sm:$0xff]   ;;  %v1387_v26 = vld [vmem:[%s2000_s1 + $0x60] ss:$8 sps:$4 sm:$0xff]   ;;  %v1389_v28 = vld [vmem:[%s2000_s1 + $0x74] ss:$8 sps:$4 sm:$0xff]  }
   0xa   :  { %v1385_v25 = vld [vmem:[%s2000_s1 + $0x164] ss:$8 sps:$4 sm:$0xff]   ;;  %v1388_v27 = vld [vmem:[%s2000_s1 + $0x160] ss:$8 sps:$4 sm:$0xff]   ;;  %v1391_v29 = vld [vmem:[%s2000_s1 + $0x174] ss:$8 sps:$4 sm:$0xff]  }
   0xb   :  { %449 = vmatpush1.bf16.msra.mxu0 %v1363_v10  ;;  %v1393_v30 = vld [vmem:[%s2000_s1 + $0x70] ss:$8 sps:$4 sm:$0xff]   ;;  %v1395_v32 = vld [vmem:[%s2000_s1 + $0x84] ss:$8 sps:$4 sm:$0xff]   ;;  %v1399_v34 = vld [vmem:[%s2000_s1 + $0x80] ss:$8 sps:$4 sm:$0xff]  }
   0xc   :  { %490 = vmatpush1.bf16.msra.mxu1 %v1364_v11  ;;  %450 = vmatprep.subr.bf16.mxu0 %v1365_v12  ;;  %v1394_v31 = vld [vmem:[%s2000_s1 + $0x170] ss:$8 sps:$4 sm:$0xff]   ;;  %v1397_v33 = vld [vmem:[%s2000_s1 + $0x184] ss:$8 sps:$4 sm:$0xff]   ;;  %v1400_v35 = vld [vmem:[%s2000_s1 + $0x180] ss:$8 sps:$4 sm:$0xff]  }
   0xd   :  { %491 = vmatprep.subr.bf16.mxu1 %v1367_v13  ;;  %v1401_v36 = vld [vmem:[%s2000_s1 + $0x94] ss:$8 sps:$4 sm:$0xff]   ;;  %v1405_v38 = vld [vmem:[%s2000_s1 + $0x90] ss:$8 sps:$4 sm:$0xff]   ;;  %v1407_v40 = vld [vmem:[%s2000_s1 + $0xa4] ss:$8 sps:$4 sm:$0xff]  }
   0xe   :  { %v1403_v37 = vld [vmem:[%s2000_s1 + $0x194] ss:$8 sps:$4 sm:$0xff]   ;;  %v1406_v39 = vld [vmem:[%s2000_s1 + $0x190] ss:$8 sps:$4 sm:$0xff]   ;;  %v1409_v41 = vld [vmem:[%s2000_s1 + $0x1a4] ss:$8 sps:$4 sm:$0xff]  }
   0xf   :  { %451 = vmatpush1.bf16.msra.mxu0 %v1369_v14  ;;  %v1411_v42 = vld [vmem:[%s2000_s1 + $0xa0] ss:$8 sps:$4 sm:$0xff]   ;;  %v1413_v44 = vld [vmem:[%s2000_s1 + $0xb4] ss:$8 sps:$4 sm:$0xff]   ;;  %v1417_v47 = vld [vmem:[%s2000_s1 + $0xb0] ss:$8 sps:$4 sm:$0xff]  }
  0x10   :  { %492 = vmatpush1.bf16.msra.mxu1 %v1370_v15  ;;  %452 = vmatprep.subr.bf16.mxu0 %v1371_v16  ;;  %v1412_v43 = vld [vmem:[%s2000_s1 + $0x1a0] ss:$8 sps:$4 sm:$0xff]   ;;  %v1415_v45 = vld [vmem:[%s2000_s1 + $0x1b4] ss:$8 sps:$4 sm:$0xff]   ;;  %v1418_v48 = vld [vmem:[%s2000_s1 + $0x1b0] ss:$8 sps:$4 sm:$0xff]  }
  0x11   :  { %493 = vmatprep.subr.bf16.mxu1 %v1373_v17  ;;  %v53_v46 = vld [vmem:[%s2001_s0 + $0x8] sm:$0xff]  ;;  %v55_v50 = vld [vmem:[%s2001_s0 + $0x18] sm:$0xff]  ;;  %v52_v4 = vld [vmem:[%s2001_s0] sm:$0xff] }
  0x12   :  { %v57_v49 = vpack.c.bf16 %v53_v46, %v53_v46  ;;  %v1419_v51 = vld [vmem:[%s2000_s1 + $0xc4] ss:$8 sps:$4 sm:$0xff]   ;;  %v59_v52 = vpack.c.bf16 %v55_v50, %v55_v50  ;;  %v1423_v54 = vld [vmem:[%s2000_s1 + $0xc0] ss:$8 sps:$4 sm:$0xff]   ;;  %v1425_v56 = vld [vmem:[%s2000_s1 + $0xd4] ss:$8 sps:$4 sm:$0xff]   ;;  %v56_v7 = vpack.c.bf16 %v52_v4, %v52_v4 }
  0x13   :  { %453 = vmatpush1.bf16.msra.mxu0 %v1375_v18  ;;  %v1421_v53 = vld [vmem:[%s2000_s1 + $0x1c4] ss:$8 sps:$4 sm:$0xff]   ;;  %v1424_v55 = vld [vmem:[%s2000_s1 + $0x1c0] ss:$8 sps:$4 sm:$0xff]   ;;  %v1427_v57 = vld [vmem:[%s2000_s1 + $0x1d4] ss:$8 sps:$4 sm:$0xff]  }
  0x14   :  { %494 = vmatpush1.bf16.msra.mxu1 %v1376_v19  ;;  %454 = vmatprep.subr.bf16.mxu0 %v1377_v20  ;;  %v1429_v58 = vld [vmem:[%s2000_s1 + $0xd0] ss:$8 sps:$4 sm:$0xff]   ;;  %v1431_v60 = vld [vmem:[%s2000_s1 + $0xe4] ss:$8 sps:$4 sm:$0xff]   ;;  %v1435_v62 = vld [vmem:[%s2000_s1 + $0xe0] ss:$8 sps:$4 sm:$0xff]  }
  0x15   :  { %495 = vmatprep.subr.bf16.mxu1 %v1379_v21  ;;  %476 = vmatprep.mubr.bf16.mxu0 %v57_v49  ;;  %v1430_v59 = vld [vmem:[%s2000_s1 + $0x1d0] ss:$8 sps:$4 sm:$0xff]   ;;  %v1433_v61 = vld [vmem:[%s2000_s1 + $0x1e4] ss:$8 sps:$4 sm:$0xff]   ;;  %v1436_v63 = vld [vmem:[%s2000_s1 + $0x1e0] ss:$8 sps:$4 sm:$0xff]  }
  0x16   :  { %517 = vmatprep.mubr.bf16.mxu1 %v59_v52  ;;  %v1437_v0 = vld [vmem:[%s2000_s1 + $0xf4] ss:$8 sps:$4 sm:$0xff]   ;;  %v1441_v2 = vld [vmem:[%s2000_s1 + $0xf0] ss:$8 sps:$4 sm:$0xff]   ;;  %v1443_v6 = vld [vmem:[%s2002_s3 + $0x40] sm:$0xff]  }
  0x17   :  { %455 = vmatpush1.bf16.msra.mxu0 %v1381_v22  ;;  %v1439_v1 = vld [vmem:[%s2000_s1 + $0x1f4] ss:$8 sps:$4 sm:$0xff]   ;;  %v1442_v3 = vld [vmem:[%s2000_s1 + $0x1f0] ss:$8 sps:$4 sm:$0xff]   ;;  %v1444_v9 = vld [vmem:[%s2002_s3] sm:$0xff]  }
  0x18   :  { %496 = vmatpush1.bf16.msra.mxu1 %v1382_v23  ;;  %456 = vmatprep.subr.bf16.mxu0 %v1383_v24  ;;  %v54_v5 = vld [vmem:[%s2001_s0 + $0x10] sm:$0xff]  ;;  %v1445_v10 = vld [vmem:[%s2002_s3 + $0x48] sm:$0xff]   ;;  %v1449_v14 = vld [vmem:[%s2002_s3 + $0x58] sm:$0xff]  }
  0x19   :  { %497 = vmatprep.subr.bf16.mxu1 %v1385_v25  ;;  %v58_v8 = vpack.c.bf16 %v54_v5, %v54_v5  ;;  %v1446_v11 = vld [vmem:[%s2002_s3 + $0x8] sm:$0xff]   ;;  %v1447_v12 = vld [vmem:[%s2002_s3 + $0x50] sm:$0xff]   ;;  %v1450_v15 = vld [vmem:[%s2002_s3 + $0x18] sm:$0xff]  }
  0x1a   :  { %v1448_v13 = vld [vmem:[%s2002_s3 + $0x10] sm:$0xff]   ;;  %v1451_v16 = vld [vmem:[%s2002_s3 + $0x60] sm:$0xff]   ;;  %v1453_v18 = vld [vmem:[%s2002_s3 + $0x68] sm:$0xff]  }
  0x1b   :  { %457 = vmatpush1.bf16.msra.mxu0 %v1387_v26  ;;  %v1452_v17 = vld [vmem:[%s2002_s3 + $0x20] sm:$0xff]   ;;  %v1454_v19 = vld [vmem:[%s2002_s3 + $0x28] sm:$0xff]   ;;  %v1455_v20 = vld [vmem:[%s2002_s3 + $0x70] sm:$0xff]  }
  0x1c   :  { %498 = vmatpush1.bf16.msra.mxu1 %v1388_v27  ;;  %458 = vmatprep.subr.bf16.mxu0 %v1389_v28  ;;  %v1456_v21 = vld [vmem:[%s2002_s3 + $0x30] sm:$0xff]   ;;  %v1457_v22 = vld [vmem:[%s2002_s3 + $0x78] sm:$0xff]   ;;  %v1459_v24 = vld [vmem:[%s2003_s5] ss:$8 sps:$4 sm:$0xff]  }
  0x1d   :  { %499 = vmatprep.subr.bf16.mxu1 %v1391_v29  ;;  %v1458_v23 = vld [vmem:[%s2002_s3 + $0x38] sm:$0xff]   ;;  %v1461_v25 = vld [vmem:[%s2003_s5 + $0x4] ss:$8 sps:$4 sm:$0xff]   ;;  %v1465_v29 = vld [vmem:[%s2003_s5 + $0x20] ss:$8 sps:$4 sm:$0xff]  }
  0x1e   :  { %v1464_v26 = vld [vmem:[%s2003_s5 + $0x14] ss:$8 sps:$4 sm:$0xff]   ;;  %v1462_v27 = vld [vmem:[%s2003_s5 + $0x10] ss:$8 sps:$4 sm:$0xff]   ;;  %v1467_v28 = vld [vmem:[%s2003_s5 + $0x24] ss:$8 sps:$4 sm:$0xff]  }
  0x1f   :  { %459 = vmatpush1.bf16.msra.mxu0 %v1393_v30  ;;  %v1470_v30 = vld [vmem:[%s2003_s5 + $0x34] ss:$8 sps:$4 sm:$0xff]   ;;  %v1484_v4 = vld [vmem:[%s2005_s8 + $0x8] sm:$0xff]  }
  0x20   :  { %500 = vmatpush1.bf16.msra.mxu1 %v1394_v31  ;;  %460 = vmatprep.subr.bf16.mxu0 %v1395_v32  ;;  %v1468_v31 = vld [vmem:[%s2003_s5 + $0x30] ss:$8 sps:$4 sm:$0xff]   ;;  %v1473_v32 = vld [vmem:[%s2003_s5 + $0x44] ss:$8 sps:$4 sm:$0xff]  }
  0x21   :  { %501 = vmatprep.subr.bf16.mxu1 %v1397_v33  ;;  %v1471_v33 = vld [vmem:[%s2003_s5 + $0x40] ss:$8 sps:$4 sm:$0xff]   ;;  %v1485_v5 = vld [vmem:[%s2005_s8 + $0x10] sm:$0xff]  }
  0x23   :  { %461 = vmatpush1.bf16.msra.mxu0 %v1399_v34  ;;  %v1476_v34 = vld [vmem:[%s2003_s5 + $0x54] ss:$8 sps:$4 sm:$0xff]  }
  0x24   :  { %502 = vmatpush1.bf16.msra.mxu1 %v1400_v35  ;;  %462 = vmatprep.subr.bf16.mxu0 %v1401_v36  ;;  %v1474_v35 = vld [vmem:[%s2003_s5 + $0x50] ss:$8 sps:$4 sm:$0xff]   ;;  %v537_v36 = vlaneseq }
  0x25   :  { %503 = vmatprep.subr.bf16.mxu1 %v1403_v37 }
  0x26   :  { %v538_v37 = vshrl.u32 %v537_v36, 7 }
  0x27   :  { %463 = vmatpush1.bf16.msra.mxu0 %v1405_v38 }
  0x28   :  { %504 = vmatpush1.bf16.msra.mxu1 %v1406_v39  ;;  %464 = vmatprep.subr.bf16.mxu0 %v1407_v40  ;;  %v1876_v38 = vsub.s32 0, %v538_v37  ;;  %v535_v39 = vld [vmem:[%s2004_s2] sm:$0x3]  ;;  %v1881_v40 = vsub.s32 1, %v538_v37 }
  0x29   :  { %505 = vmatprep.subr.bf16.mxu1 %v1409_v41 }
  0x2a   :  { %v540_v41 = vrot.slane %v535_v39, %v1876_v38 }
  0x2b   :  { %465 = vmatpush1.bf16.msra.mxu0 %v1411_v42 }
  0x2c   :  { %506 = vmatpush1.bf16.msra.mxu1 %v1412_v43  ;;  %466 = vmatprep.subr.bf16.mxu0 %v1413_v44  ;;  %v544_v44 = vrot.slane %v535_v39, %v1881_v40 }
  0x2d   :  { %507 = vmatprep.subr.bf16.mxu1 %v1415_v45 }
  0x2f   :  { %467 = vmatpush1.bf16.msra.mxu0 %v1417_v47 }
  0x30   :  { %508 = vmatpush1.bf16.msra.mxu1 %v1418_v48  ;;  %468 = vmatprep.subr.bf16.mxu0 %v1419_v51 }
  0x31   :  { %509 = vmatprep.subr.bf16.mxu1 %v1421_v53 }
  0x33   :  { %469 = vmatpush1.bf16.msra.mxu0 %v1423_v54 }
  0x34   :  { %510 = vmatpush1.bf16.msra.mxu1 %v1424_v55  ;;  %470 = vmatprep.subr.bf16.mxu0 %v1425_v56 }
  0x35   :  { %511 = vmatprep.subr.bf16.mxu1 %v1427_v57 }
  0x37   :  { %471 = vmatpush1.bf16.msra.mxu0 %v1429_v58 }
  0x38   :  { %512 = vmatpush1.bf16.msra.mxu1 %v1430_v59  ;;  %472 = vmatprep.subr.bf16.mxu0 %v1431_v60 }
  0x39   :  { %513 = vmatprep.subr.bf16.mxu1 %v1433_v61  ;;  %v1479_v61 = vld [vmem:[%s2003_s5 + $0x64] ss:$8 sps:$4 sm:$0xff]  }
  0x3b   :  { %473 = vmatpush1.bf16.msra.mxu0 %v1435_v62  ;;  %v1477_v62 = vld [vmem:[%s2003_s5 + $0x60] ss:$8 sps:$4 sm:$0xff]  }
  0x3c   :  { %514 = vmatpush1.bf16.msra.mxu1 %v1436_v63  ;;  %474 = vmatprep.subr.bf16.mxu0 %v1437_v0  ;;  %v1482_v63 = vld [vmem:[%s2003_s5 + $0x74] ss:$8 sps:$4 sm:$0xff]   ;;  %v1480_v0 = vld [vmem:[%s2003_s5 + $0x70] ss:$8 sps:$4 sm:$0xff]  }
  0x3d   :  { %515 = vmatprep.subr.bf16.mxu1 %v1439_v1  ;;  %v1515_v1 = vmov 0  }
  0x3f   :  { %475 = vmatpush1.bf16.msra.mxu0 %v1441_v2  ;;  %v1516_v2 = vmov 0.0  }
  0x40   :  { %516 = vmatpush1.bf16.msra.mxu1 %v1442_v3  ;;  %1293 = vmatprep.subr.bf16.mxu0 %v1443_v6  ;;  %v1483_v3 = vld [vmem:[%s2005_s8] sm:$0xff]   ;;  %v1486_v6 = vld [vmem:[%s2005_s8 + $0x18] sm:$0xff]  }
  0x41   :  { %844 = vmatprep.subr.bf16.mxu1 %v1461_v25  ;;  %v1499_v25 = vld [vmem:[%s2007_s10 + $0x24] ss:$8 sps:$4 sm:$0xff]  }
  0x42   :  { %477 = vmatmul.mubr.bf16.vlgmr.msra.gmra.mrb[0].mxu0 %v56_v7  ;;  %v1487_v7 = vld [vmem:[%s2005_s8 + $0x20] sm:$0xff]  }
  0x43   :  { %518 = vmatmul.mubr.bf16.vlgmr.msra.gmra.mrb[0].mxu1 %v58_v8  ;;  %1294 = vmatpush3.bf16.msra.mxu0 %v1444_v9  ;;  %v1488_v8 = vld [vmem:[%s2005_s8 + $0x28] sm:$0xff]  }
  0x44   :  { %1295 = vmatprep.subr.bf16.mxu0 %v1445_v10  ;;  %845 = vmatpush1.bf16.msra.mxu1 %v1459_v24  ;;  %v1235_v10 = vld [vmem:[%s2006_s4] ss:$0 sm:$0xff]  ;;  %v1494_v24 = vld [vmem:[%s2007_s10 + $0x10] ss:$8 sps:$4 sm:$0xff]  }
  0x45   :  { %846 = vmatprep.subr.bf16.mxu1 %v1464_v26  ;;  %876 = vmatprep.mubr.bf16.mxu1 %v1515_v1  ;;  %v1497_v26 = vld [vmem:[%s2007_s10 + $0x20] ss:$8 sps:$4 sm:$0xff]  }
  0x47   :  { %1296 = vmatpush3.bf16.msra.mxu0 %v1446_v11 }
  0x48   :  { %1297 = vmatprep.subr.bf16.mxu0 %v1447_v12  ;;  %847 = vmatpush1.bf16.msra.mxu1 %v1462_v27  ;;  %v1502_v27 = vld [vmem:[%s2007_s10 + $0x34] ss:$8 sps:$4 sm:$0xff]  }
  0x49   :  { %848 = vmatprep.subr.bf16.mxu1 %v1467_v28  ;;  %v1500_v28 = vld [vmem:[%s2007_s10 + $0x30] ss:$8 sps:$4 sm:$0xff]  }
  0x4b   :  { %1298 = vmatpush3.bf16.msra.mxu0 %v1448_v13 }
  0x4c   :  { %1299 = vmatprep.subr.bf16.mxu0 %v1449_v14  ;;  %849 = vmatpush1.bf16.msra.mxu1 %v1465_v29  ;;  %v1505_v29 = vld [vmem:[%s2007_s10 + $0x44] ss:$8 sps:$4 sm:$0xff]  }
  0x4d   :  { %850 = vmatprep.subr.bf16.mxu1 %v1470_v30  ;;  %v1503_v30 = vld [vmem:[%s2007_s10 + $0x40] ss:$8 sps:$4 sm:$0xff]  }
  0x4f   :  { %1300 = vmatpush3.bf16.msra.mxu0 %v1450_v15 }
  0x50   :  { %1301 = vmatprep.subr.bf16.mxu0 %v1451_v16  ;;  %851 = vmatpush1.bf16.msra.mxu1 %v1468_v31  ;;  %v1508_v31 = vld [vmem:[%s2007_s10 + $0x54] ss:$8 sps:$4 sm:$0xff]  }
  0x51   :  { %852 = vmatprep.subr.bf16.mxu1 %v1473_v32  ;;  %v1506_v32 = vld [vmem:[%s2007_s10 + $0x50] ss:$8 sps:$4 sm:$0xff]  }
  0x53   :  { %1302 = vmatpush3.bf16.msra.mxu0 %v1452_v17 }
  0x54   :  { %1303 = vmatprep.subr.bf16.mxu0 %v1453_v18  ;;  %853 = vmatpush1.bf16.msra.mxu1 %v1471_v33  ;;  %v752_v33 = vld [vmem:[%s2008_s6] sm:$0x3] }
  0x55   :  { %854 = vmatprep.subr.bf16.mxu1 %v1476_v34  ;;  %v757_v34 = vrot.slane %v752_v33, %v1876_v38 }
  0x57   :  { %1304 = vmatpush3.bf16.msra.mxu0 %v1454_v19  ;;  %v1489_v19 = vld [vmem:[%s2005_s8 + $0x30] sm:$0xff]  }
  0x58   :  { %1305 = vmatprep.subr.bf16.mxu0 %v1455_v20  ;;  %855 = vmatpush1.bf16.msra.mxu1 %v1474_v35  ;;  %v1490_v20 = vld [vmem:[%s2005_s8 + $0x38] sm:$0xff]   ;;  %v761_v35 = vrot.slane %v752_v33, %v1881_v40 }
  0x59   :  { %856 = vmatprep.subr.bf16.mxu1 %v1479_v61  ;;  %v1022_v61 = vld [vmem:[%s2012_s11] sm:$0x3] }
  0x5b   :  { %1306 = vmatpush3.bf16.msra.mxu0 %v1456_v21  ;;  %v1491_v21 = vld [vmem:[%s2007_s10] ss:$8 sps:$4 sm:$0xff]  }
  0x5c   :  { %1307 = vmatprep.subr.bf16.mxu0 %v1457_v22  ;;  %857 = vmatpush1.bf16.msra.mxu1 %v1477_v62  ;;  %v1493_v22 = vld [vmem:[%s2007_s10 + $0x4] ss:$8 sps:$4 sm:$0xff]   ;;  %v1027_v62 = vrot.slane %v1022_v61, %v1876_v38 }
  0x5d   :  { %858 = vmatprep.subr.bf16.mxu1 %v1482_v63  ;;  %v1031_v63 = vrot.slane %v1022_v61, %v1881_v40 }
  0x5f   :  { %1308 = vmatpush3.bf16.msra.mxu0 %v1458_v23  ;;  %v1496_v23 = vld [vmem:[%s2007_s10 + $0x14] ss:$8 sps:$4 sm:$0xff]  }
  0x60   :  { %859 = vmatpush1.bf16.msra.mxu1 %v1480_v0  ;;  %1324 = vmatprep.subr.bf16.mxu0 %v1516_v2 }
  0x61   :  { %1114 = vmatprep.subr.bf16.mxu1 %v1493_v22 }
 0x115   :  { %v478_v42 = vpop.f32.mrb[0].mxu0 }
 0x116   :  { %v519_v43 = vpop.f32.mrb[0].mxu1  ;;  %v480_v46 = vpop.f32.mrb[1].mxu0 }
 0x117   :  { %v520_v45 = vadd.f32 %v519_v43, %v478_v42  ;;  %v521_v47 = vpop.f32.mrb[1].mxu1  ;;  %v482_v49 = vpop.f32.mrb[2].mxu0 }
 0x118   :  { %v522_v48 = vadd.f32 %v521_v47, %v480_v46  ;;  %v523_v50 = vpop.f32.mrb[2].mxu1  ;;  %v483_v52 = vpop.f32.mrb[3].mxu0  ;;  %v1509_v49 = vld [vmem:[%s2007_s10 + $0x60] ss:$8 sps:$4 sm:$0xff]  }
 0x119   :  { %v547_v51 = vadd.f32 %v540_v41, %v520_v45  ;;  %v524_v53 = vpop.f32.mrb[3].mxu1  ;;  %v887_v41 = vld [vmem:[%s2009_s7] sm:$0xff]  ;;  %v1514_v50 = vld [vmem:[%s2007_s10 + $0x74] ss:$8 sps:$4 sm:$0xff]  }
 0x11a   :  { %v548_v54 = vadd.f32 %v544_v44, %v522_v48  ;;  %v1511_v48 = vld [vmem:[%s2007_s10 + $0x64] ss:$8 sps:$4 sm:$0xff]   ;;  %v1268_v52 = vld [vmem:[%s2011_s9] ss:$0 sm:$0xff] }
 0x11b   :  { %vm549_vm0 = vcmp.gt.f32.partialorder %v547_v51, 0.0  ;;  %v551_v55 = vmul.f32 0.2, %v547_v51 }
 0x11c   :  { %v552_v56 = vmul.f32 0.2, %v548_v54  ;;  %vm550_vm1 = vcmp.gt.f32.partialorder %v548_v54, 0.0 }
 0x11d   :  { %v553_v57 = vsel %vm549_vm0, %v547_v51, %v551_v55  ;;  %v1512_v51 = vld [vmem:[%s2007_s10 + $0x70] ss:$8 sps:$4 sm:$0xff]  }
 0x11e   :  { %v554_v58 = vsel %vm550_vm1, %v548_v54, %v552_v56  ;;  %v555_v60 = vpack.c.bf16 %v553_v57, %v553_v57 }
 0x11f   :  { %v556_v59 = vpack.c.bf16 %v554_v58, %v554_v58 }
 0x121   :  { %724 = vmatprep.mubr.bf16.mxu0 %v556_v59 }
 0x122   :  { %725 = vmatmul.mubr.bf16.vlgmr.msra.gmra.mrb[4].mxu0 %v555_v60 }
 0x123   :  { %1325 = vmatpush3.bf16.msra.mxu0 %v1483_v3  ;;  %1340 = vmatprep.mubr.msk.bf16.mxu0 %vm1517_vm3, %v1516_v2 }
 0x124   :  { %1326 = vmatprep.subr.bf16.mxu0 %v1516_v2 }
 0x127   :  { %1327 = vmatpush3.bf16.msra.mxu0 %v1484_v4 }
 0x128   :  { %1328 = vmatprep.subr.bf16.mxu0 %v1516_v2 }
 0x12b   :  { %1329 = vmatpush3.bf16.msra.mxu0 %v1485_v5 }
 0x12c   :  { %1330 = vmatprep.subr.bf16.mxu0 %v1516_v2 }
 0x12f   :  { %1331 = vmatpush3.bf16.msra.mxu0 %v1486_v6 }
 0x130   :  { %1332 = vmatprep.subr.bf16.mxu0 %v1516_v2 }
 0x133   :  { %1333 = vmatpush3.bf16.msra.mxu0 %v1487_v7 }
 0x134   :  { %1334 = vmatprep.subr.bf16.mxu0 %v1516_v2 }
 0x137   :  { %1335 = vmatpush3.bf16.msra.mxu0 %v1488_v8 }
 0x138   :  { %1336 = vmatprep.subr.bf16.mxu0 %v1516_v2 }
 0x13b   :  { %1337 = vmatpush3.bf16.msra.mxu0 %v1489_v19 }
 0x13c   :  { %1338 = vmatprep.subr.bf16.mxu0 %v1516_v2 }
 0x13f   :  { %1339 = vmatpush3.bf16.msra.mxu0 %v1490_v20 }
 0x1f5   :  { %v1309_v9 = vpop.f32.mrb[4].mxu0 }
 0x1f6   :  { %v1310_v11 = vpop.f32.mrb[5].mxu0 }
 0x1f7   :  { %v1311_v12 = vadd.f32 %v1310_v11, %v1309_v9  ;;  %v1312_v13 = vpop.f32.mrb[6].mxu0 }
 0x1f8   :  { %v1313_v14 = vpop.f32.mrb[7].mxu0 }
 0x1f9   :  { %v727_v15 = vadd.f32 %v1311_v12, %v1235_v10 }
 0x1fb   :  { %vm732_vm2 = vcmp.gt.f32.partialorder %v727_v15, 0.0  ;;  %v733_v16 = vmul.f32 0.2, %v727_v15 }
 0x1fd   :  { %v734_v17 = vsel %vm732_vm2, %v727_v15, %v733_v16 }
 0x1fe   :  { %v735_v18 = vpack.c.bf16 %v734_v17, %v734_v17 }
 0x200   :  { %877 = vmatmul.mubr.bf16.vlgmr.msra.gmra.mrb[4].mxu1 %v735_v18 }
 0x201   :  { %1146 = vmatprep.mubr.bf16.mxu1 %v1515_v1  ;;  %1115 = vmatpush1.bf16.msra.mxu1 %v1491_v21 }
 0x202   :  { %1116 = vmatprep.subr.bf16.mxu1 %v1496_v23 }
 0x205   :  { %1117 = vmatpush1.bf16.msra.mxu1 %v1494_v24 }
 0x206   :  { %1118 = vmatprep.subr.bf16.mxu1 %v1499_v25 }
 0x209   :  { %1119 = vmatpush1.bf16.msra.mxu1 %v1497_v26 }
 0x20a   :  { %1120 = vmatprep.subr.bf16.mxu1 %v1502_v27 }
 0x20d   :  { %1121 = vmatpush1.bf16.msra.mxu1 %v1500_v28 }
 0x20e   :  { %1122 = vmatprep.subr.bf16.mxu1 %v1505_v29 }
 0x211   :  { %1123 = vmatpush1.bf16.msra.mxu1 %v1503_v30 }
 0x212   :  { %1124 = vmatprep.subr.bf16.mxu1 %v1508_v31 }
 0x215   :  { %1125 = vmatpush1.bf16.msra.mxu1 %v1506_v32 }
 0x216   :  { %1126 = vmatprep.subr.bf16.mxu1 %v1511_v48 }
 0x219   :  { %1127 = vmatpush1.bf16.msra.mxu1 %v1509_v49 }
 0x21a   :  { %1128 = vmatprep.subr.bf16.mxu1 %v1514_v50 }
 0x21d   :  { %1129 = vmatpush1.bf16.msra.mxu1 %v1512_v51 }
 0x2d3   :  { %v878_v36 = vpop.f32.mrb[4].mxu1 }
 0x2d4   :  { %v879_v37 = vadd.f32 %v878_v36, %v757_v34  ;;  %v880_v39 = vpop.f32.mrb[5].mxu1 }
 0x2d5   :  { %v881_v42 = vadd.f32 %v880_v39, %v761_v35  ;;  %v882_v43 = vpop.f32.mrb[6].mxu1 }
 0x2d6   :  { %885 = vst [vmem:[%s2010_s12] sm:$0xff] %v879_v37  ;;  %v883_v44 = vpop.f32.mrb[7].mxu1 }
 0x2d7   :  { %886 = vst [vmem:[%s2010_s12 + $0x8] sm:$0xff] %v881_v42  ;;  %v888_v45 = vmul.f32 %v887_v41, %v881_v42 }
 0x2d9   :  { %v889_v46 = vadd.f32 %v888_v45, %v879_v37 }
 0x2db   :  { %v890_v47 = vpack.c.bf16 %v889_v46, %v889_v46 }
 0x2dd   :  { %1341 = vmatmul.mubr.bf16.vlgmr.msra.gmra.mrb[8].mxu0 %v890_v47 }
 0x3b0   :  { %v996_v53 = vpop.f32.mrb[8].mxu0 }
 0x3b1   :  { %v997_v54 = vadd.f32 %v1268_v52, %v996_v53  ;;  %v1342_v55 = vpop.f32.mrb[9].mxu0 }
 0x3b2   :  { %v999_v56 = vpop.f32.mrb[10].mxu0 }
 0x3b3   :  { %vm1002_vm4 = vcmp.gt.f32.partialorder %v997_v54, 0.0  ;;  %v1003_v57 = vmul.f32 0.2, %v997_v54  ;;  %v1343_v58 = vpop.f32.mrb[11].mxu0 }
 0x3b5   :  { %v1004_v59 = vsel %vm1002_vm4, %v997_v54, %v1003_v57 }
 0x3b6   :  { %v1005_v60 = vpack.c.bf16 %v1004_v59, %v1004_v59 }
 0x3b8   :  { %1147 = vmatmul.mubr.bf16.vlgmr.msra.gmra.mrb[8].mxu1 %v1005_v60 }
 0x48b   :  { %v1148_v0 = vpop.f32.mrb[8].mxu1 }
 0x48c   :  { %v1149_v1 = vadd.f32 %v1148_v0, %v1027_v62  ;;  %v1150_v2 = vpop.f32.mrb[9].mxu1 }
 0x48d   :  { %v1151_v3 = vadd.f32 %v1150_v2, %v1031_v63  ;;  %v1152_v4 = vpop.f32.mrb[10].mxu1 }
 0x48e   :  { %vm1155_vm5 = vcmp.gt.f32.partialorder %v1149_v1, 0.0  ;;  %v1157_v5 = vmul.f32 0.2, %v1149_v1  ;;  %v1153_v6 = vpop.f32.mrb[11].mxu1 }
 0x48f   :  { %vm1156_vm6 = vcmp.gt.f32.partialorder %v1151_v3, 0.0  ;;  %v1158_v7 = vmul.f32 0.2, %v1151_v3 }
 0x490   :  { %v1159_v8 = vsel %vm1155_vm5, %v1149_v1, %v1157_v5 }
 0x491   :  { %1161 = vst [vmem:[%s2013_s13] sm:$0xff] %v1159_v8  ;;  %v1160_v9 = vsel %vm1156_vm6, %v1151_v3, %v1158_v7 }
 0x492   :  { %1162 = vst [vmem:[%s2013_s13 + $0x8] sm:$0xff] %v1160_v9 }

</bundles_post_ra>
